<compile_context>
chip_gen: v7x
topology: tpu7x:2x2x1
jax: 0.10.0
libtpu: 0.0.40
codegen_flags: <defaults>
</compile_context>

<pallas_src>
import numpy as np
import jax
import jax.numpy as jnp
from jax.experimental import pallas as pl
from jax.experimental.pallas import tpu as pltpu


# ----------------------------------------------------------- static helpers --

def _bilinear_matrix(n_in, n_out):
    """(n_out, n_in) interpolation matrix: bilinear, align_corners=True."""
    m = np.zeros((n_out, n_in), dtype=np.float64)
    if n_out == 1 or n_in == 1:
        m[:, 0] = 1.0
        return m.astype(np.float32)
    src = np.arange(n_out) * (n_in - 1) / (n_out - 1)
    i0 = np.clip(np.floor(src).astype(np.int64), 0, n_in - 1)
    i1 = np.clip(i0 + 1, 0, n_in - 1)
    frac = src - i0
    for j in range(n_out):
        m[j, i0[j]] += 1.0 - frac[j]
        m[j, i1[j]] += frac[j]
    return m.astype(np.float32)


def _padded_interp_matrix(n_in, n_out, n_total):
    """(n_total, n_in): interpolation rows centred, zero rows = padding."""
    p = np.zeros((n_total, n_in), dtype=np.float32)
    off = (n_total - n_out) // 2
    p[off:off + n_out, :] = _bilinear_matrix(n_in, n_out)
    return p


def _band(n_in, n_out, k=3):
    """(k, n_in, n_out) 0/1 selector: band[kk, v + kk, v] = 1 (valid conv taps)."""
    b = np.zeros((k, n_in, n_out), dtype=np.float32)
    for kk in range(k):
        for v in range(n_out):
            b[kk, v + kk, v] = 1.0
    return b


def _round_up(x, m):
    return ((x + m - 1) // m) * m


# ----------------------------------------------------------------- Up fused --

@jax.jit
def up_forward(bottom_x, skip_x, params):
    """bottom_x: (N, Cin, Hb, Wb) NCHW; skip_x: (N, Cskip, SH, SW) NCHW."""
    eps = 1e-5
    f32, bf16 = jnp.float32, jnp.bfloat16

    N, Cin, Hb, Wb = bottom_x.shape
    _, Cskip, SH, SW = skip_x.shape
    Cout = params["pw_w"].shape[0]
    Ccat = params["c1_w"].shape[1]
    assert Ccat == Cskip + Cout, "concat channels must match conv1 in_channels"
    Ho, Wo = 2 * Hb, 2 * Wb
    assert Ho <= SH and Wo <= SW
    Ho1, Wo1 = SH - 2, SW - 2          # conv1 valid output
    Ho2, Wo2 = Ho1 - 2, Wo1 - 2        # conv2 valid output
    cnt1 = float(N * Ho1 * Wo1)
    cnt2 = float(N * Ho2 * Wo2)

    CATW = SW * Ccat                                  # concat slab lane width
    P = _round_up(max(Wo1, Wo2) * Cout, 128)          # lane-dense conv output width
    assert P % Cout == 0  # TODO(synk): general Cout needs a different lane pad.

    # ---- boundary layout prep (tiny, XLA) -----------------------------------
    # activations -> "row slab": rows = (n, h), lanes = (w, c); bf16 for MXU/DMA.
    x_slab = jnp.transpose(bottom_x, (0, 2, 3, 1)).reshape(N * Hb, Wb * Cin).astype(bf16)
    skip_slab = jnp.transpose(skip_x, (0, 2, 3, 1)).reshape(N * SH, SW * Cskip).astype(bf16)

    # bilinear x2 + centred zero pad (separable).  H-interp is block-diagonal
    # across the batch so the whole batch is ONE matmul inside the kernel.
    mhp = _padded_interp_matrix(Hb, Ho, SH)                               # (SH, Hb)
    mhp_blk = jnp.asarray(np.kron(np.eye(N, dtype=np.float32), mhp)).astype(bf16)
    mwp = _padded_interp_matrix(Wb, Wo, SW)                               # (SW, Wb)
    # fold the 1x1 PointWiseConv (no bias) into the W-axis interpolation.
    r_mat = jnp.einsum("wi,oc->icwo", jnp.asarray(mwp),
                       params["pw_w"]).reshape(Wb * Cin, SW * Cout).astype(bf16)

    # 3x3 valid convs as 3 banded lane-mixing matrices (one per kh); skip and
    # upsampled channel groups concatenated along the input-lane axis; output
    # lanes zero-padded to P (=128) so every store is lane-dense.
    band1 = jnp.asarray(_band(SW, Wo1))
    band2 = jnp.asarray(_band(Wo1, Wo2))
    w1t = jnp.transpose(params["c1_w"], (2, 3, 1, 0))                     # (3,3,Ccat,Cout)
    w1s = jnp.einsum("bwv,abco->awcvo", band1,
                     w1t[:, :, :Cskip, :]).reshape(3, SW * Cskip, Wo1 * Cout)
    w1p = jnp.einsum("bwv,abco->awcvo", band1,
                     w1t[:, :, Cskip:, :]).reshape(3, SW * Cout, Wo1 * Cout)
    w1cat = jnp.pad(jnp.concatenate([w1s, w1p], axis=1),
                    ((0, 0), (0, 0), (0, P - Wo1 * Cout))).astype(bf16)   # (3, CATW, P)
    w2t = jnp.transpose(params["c2_w"], (2, 3, 1, 0))                     # (3,3,Cout,Cout)
    w2m = jnp.einsum("bwv,abco->awcvo", band2, w2t).reshape(3, Wo1 * Cout, Wo2 * Cout)
    w2pad = jnp.pad(w2m, ((0, 0), (0, P - Wo1 * Cout),
                          (0, P - Wo2 * Cout))).astype(bf16)              # (3, P, P)

    # packed selectors / per-channel BN params (2 small inputs instead of 8).
    eyeP = np.tile(np.eye(Cout, dtype=np.float32), (P // Cout, 1))        # (P, Cout)
    sel1_np = eyeP.copy(); sel1_np[Wo1 * Cout:, :] = 0.0                  # exclude pad lanes
    sel2_np = eyeP.copy(); sel2_np[Wo2 * Cout:, :] = 0.0
    sel_pack = jnp.asarray(np.concatenate([sel1_np, sel2_np], axis=1))    # (P, 2*Cout)
    misc_pack = jnp.concatenate(
        [jnp.asarray(eyeP.T),                                             # rows 0:Cout  selT
         jnp.tile(params["bn1_g"], P // Cout)[None, :],                   # row Cout     gamma1
         jnp.tile(params["bn1_b"], P // Cout)[None, :],                   # row Cout+1   beta1
         jnp.tile(params["bn2_g"], P // Cout)[None, :],                   # row Cout+2   gamma2
         jnp.tile(params["bn2_b"], P // Cout)[None, :]], axis=0)          # (Cout+4, P)

    # ---- the fused kernel ----------------------------------------------------
    def kernel(x_ref, skip_ref, mhp_ref, r_ref, w1_ref, w2_ref, sel_ref, misc_ref,
               out_ref, cat_scr, z1_scr, z2_scr, h_scr):
        # (1) bilinear x2 + folded 1x1 conv + centred zero pad (whole batch,
        #     two matmuls).  Concat([skip, upsampled]) realised by lane layout.
        g = jnp.dot(x_ref[...], r_ref[...], preferred_element_type=jnp.float32)
        pw = jnp.dot(mhp_ref[...], g.astype(jnp.bfloat16),
                     preferred_element_type=jnp.float32)                 # (N*SH, SW*Cout)
        cat_scr[:, 0:SW * Cskip] = skip_ref[...]
        cat_scr[:, SW * Cskip:CATW] = pw.astype(jnp.bfloat16)

        # (2) conv1 3x3 valid: 3 full-slab banded matmuls + per-batch kh-shift adds.
        cat_f = cat_scr[...]
        for kh in range(3):
            z1_scr[kh] = jnp.dot(cat_f, w1_ref[kh], preferred_element_type=jnp.float32)
        y1 = jnp.concatenate(
            [z1_scr[0, n * SH:n * SH + Ho1, :]
             + z1_scr[1, n * SH + 1:n * SH + 1 + Ho1, :]
             + z1_scr[2, n * SH + 2:n * SH + 2 + Ho1, :] for n in range(N)],
            axis=0)                                                       # (N*Ho1, P) f32

        # (3) BN1 (batch stats; conv bias omitted — cancels in y-mean) + ReLU.
        sel1 = sel_ref[:, 0:Cout]
        selT = misc_ref[0:Cout, :]
        mean_c = jnp.dot(jnp.sum(y1, axis=0, keepdims=True), sel1,
                         preferred_element_type=jnp.float32) / cnt1       # (1, Cout)
        mean_l = jnp.dot(mean_c, selT, preferred_element_type=jnp.float32)
        var_c = jnp.dot(jnp.sum((y1 - mean_l) ** 2, axis=0, keepdims=True), sel1,
                        preferred_element_type=jnp.float32) / cnt1
        rstd_l = jax.lax.rsqrt(
            jnp.dot(var_c, selT, preferred_element_type=jnp.float32) + eps)
        h_scr[...] = jnp.maximum(
            (y1 - mean_l) * rstd_l * misc_ref[Cout:Cout + 1, :]
            + misc_ref[Cout + 1:Cout + 2, :], 0.0).astype(jnp.bfloat16)

        # (4) conv2 3x3 valid, same batched banded scheme.
        h_f = h_scr[...]
        for kh in range(3):
            z2_scr[kh] = jnp.dot(h_f, w2_ref[kh], preferred_element_type=jnp.float32)
        y2 = jnp.concatenate(
            [z2_scr[0, n * Ho1:n * Ho1 + Ho2, :]
             + z2_scr[1, n * Ho1 + 1:n * Ho1 + 1 + Ho2, :]
             + z2_scr[2, n * Ho1 + 2:n * Ho1 + 2 + Ho2, :] for n in range(N)],
            axis=0)                                                       # (N*Ho2, P) f32

        # (5) BN2 + ReLU, single lane-dense (P=128 wide) store.
        sel2 = sel_ref[:, Cout:2 * Cout]
        mean2_c = jnp.dot(jnp.sum(y2, axis=0, keepdims=True), sel2,
                          preferred_element_type=jnp.float32) / cnt2
        mean2_l = jnp.dot(mean2_c, selT, preferred_element_type=jnp.float32)
        var2_c = jnp.dot(jnp.sum((y2 - mean2_l) ** 2, axis=0, keepdims=True), sel2,
                         preferred_element_type=jnp.float32) / cnt2
        rstd2_l = jax.lax.rsqrt(
            jnp.dot(var2_c, selT, preferred_element_type=jnp.float32) + eps)
        out_ref[...] = jnp.maximum(
            (y2 - mean2_l) * rstd2_l * misc_ref[Cout + 2:Cout + 3, :]
            + misc_ref[Cout + 3:Cout + 4, :], 0.0)

    vspec = pl.BlockSpec(memory_space=pltpu.MemorySpace.VMEM)
    out_slab = pl.pallas_call(
        kernel,
        out_shape=jax.ShapeDtypeStruct((N * Ho2, P), f32),
        in_specs=[vspec] * 8,
        out_specs=vspec,
        scratch_shapes=[
            pltpu.VMEM((N * SH, CATW), bf16),     # concat([skip, upsampled]) slab
            pltpu.VMEM((3, N * SH, P), f32),      # conv1 per-kh banded matmuls
            pltpu.VMEM((3, N * Ho1, P), f32),     # conv2 per-kh banded matmuls
            pltpu.VMEM((N * Ho1, P), bf16),       # BN1/ReLU slab (conv2 input)
        ],
    )(x_slab, skip_slab, mhp_blk, r_mat, w1cat, w2pad, sel_pack, misc_pack)

    # slab -> NHWC -> NCHW (single boundary slice/transpose, a few KB)
    out = out_slab[:, :Wo2 * Cout].reshape(N, Ho2, Wo2, Cout)
    return jnp.transpose(out, (0, 3, 1, 2))


# ------------------------------------------------------------ params / ref --

def init_up_params(key, in_channels, out_channels):
    ks = jax.random.split(key, 9)
    s = 0.1
    return {
        # PointWiseConv(in_channels, out_channels, bias=False): 1x1 conv
        "pw_w": s * jax.random.normal(ks[0], (out_channels, in_channels), jnp.float32),
        # DoubleConv (separable=False)
        "c1_w": s * jax.random.normal(ks[1], (out_channels, in_channels, 3, 3), jnp.float32),
        "c1_b": s * jax.random.normal(ks[2], (out_channels,), jnp.float32),
        "bn1_g": 1.0 + s * jax.random.normal(ks[3], (out_channels,), jnp.float32),
        "bn1_b": s * jax.random.normal(ks[4], (out_channels,), jnp.float32),
        "c2_w": s * jax.random.normal(ks[5], (out_channels, out_channels, 3, 3), jnp.float32),
        "c2_b": s * jax.random.normal(ks[6], (out_channels,), jnp.float32),
        "bn2_g": 1.0 + s * jax.random.normal(ks[7], (out_channels,), jnp.float32),
        "bn2_b": s * jax.random.normal(ks[8], (out_channels,), jnp.float32),
    }


def up_reference(bottom_x, skip_x, params, eps=1e-5):
    """Pure-XLA reference (NCHW, f32, with conv biases), for the correctness check."""
    N, Cin, Hb, Wb = bottom_x.shape
    SH, SW = skip_x.shape[2], skip_x.shape[3]
    Ho, Wo = 2 * Hb, 2 * Wb
    mh = jnp.asarray(_bilinear_matrix(Hb, Ho))
    mw = jnp.asarray(_bilinear_matrix(Wb, Wo))
    up = jnp.einsum("Hh,Ww,nchw->ncHW", mh, mw, bottom_x)
    pw = jnp.einsum("oc,ncHW->noHW", params["pw_w"], up)
    dh, dw = SH - Ho, SW - Wo
    pw = jnp.pad(pw, ((0, 0), (0, 0),
                      (dh // 2, dh - dh // 2), (dw // 2, dw - dw // 2)))
    x = jnp.concatenate([skip_x, pw], axis=1)

    def conv_bn_relu(x, w, b, g, be):
        y = jax.lax.conv_general_dilated(
            x, w, (1, 1), "VALID",
            dimension_numbers=("NCHW", "OIHW", "NCHW"))
        y = y + b[None, :, None, None]
        m = jnp.mean(y, axis=(0, 2, 3), keepdims=True)
        v = jnp.var(y, axis=(0, 2, 3), keepdims=True)
        yhat = (y - m) * jax.lax.rsqrt(v + eps)
        return jnp.maximum(yhat * g[None, :, None, None] + be[None, :, None, None], 0.0)

    y = conv_bn_relu(x, params["c1_w"], params["c1_b"], params["bn1_g"], params["bn1_b"])
    y = conv_bn_relu(y, params["c2_w"], params["c2_b"], params["bn2_g"], params["bn2_b"])
    return y


# --------------------------------------------------------------------- main --

if __name__ == "__main__":
    key = jax.random.PRNGKey(0)
    k_b, k_s, k_p = jax.random.split(key, 3)

    batch = 2
    in_channels, out_channels = 8, 4
    skip_channels = in_channels - out_channels   # concat back to in_channels
    Hb = Wb = 7          # bottom 7x7 -> upsampled 14x14 -> padded 16x16
    S = 16               # skip spatial

    bottom_x = jax.random.normal(k_b, (batch, in_channels, Hb, Wb), jnp.float32)
    skip_x = jax.random.normal(k_s, (batch, skip_channels, S, S), jnp.float32)
    params = init_up_params(k_p, in_channels, out_channels)

    out = up_forward(bottom_x, skip_x, params)
    jax.block_until_ready(out)
    assert out.shape == (batch, out_channels, S - 4, S - 4), out.shape

    ref = up_reference(bottom_x, skip_x, params)
    # tolerance loosened slightly vs the f32 version: MXU operands are bf16 now.
    assert np.allclose(np.asarray(out), np.asarray(ref), atol=5e-2, rtol=5e-2), \
        "Pallas output does not match XLA reference"
    print("KERNEL_OK")
</pallas_src>

<mosaic_0001>
module attributes {stable_mosaic.version = 11 : i64} {
  func.func @kernel(%arg0: memref<14x56xbf16, #tpu.memory_space<vmem>>, %arg1: memref<32x64xbf16, #tpu.memory_space<vmem>>, %arg2: memref<32x14xbf16, #tpu.memory_space<vmem>>, %arg3: memref<56x64xbf16, #tpu.memory_space<vmem>>, %arg4: memref<3x128x128xbf16, #tpu.memory_space<vmem>>, %arg5: memref<3x128x128xbf16, #tpu.memory_space<vmem>>, %arg6: memref<128x8xf32, #tpu.memory_space<vmem>>, %arg7: memref<8x128xf32, #tpu.memory_space<vmem>>, %arg8: memref<24x128xf32, #tpu.memory_space<vmem>>, %arg9: memref<32x128xbf16, #tpu.memory_space<vmem>>, %arg10: memref<3x32x128xf32, #tpu.memory_space<vmem>>, %arg11: memref<3x28x128xf32, #tpu.memory_space<vmem>>, %arg12: memref<28x128xbf16, #tpu.memory_space<vmem>>) attributes {dimension_semantics = [], scalar_prefetch = 0 : i64, scratch_operands = 4 : i64, tpu.core_type = #tpu.core_type<tc>} {
    %c0 = arith.constant 0 : index
    %c0_0 = arith.constant 0 : index
    %0 = vector.load %arg0[%c0, %c0_0] : memref<14x56xbf16, #tpu.memory_space<vmem>>, vector<14x56xbf16>
    %c0_1 = arith.constant 0 : index
    %c0_2 = arith.constant 0 : index
    %1 = vector.load %arg3[%c0_1, %c0_2] : memref<56x64xbf16, #tpu.memory_space<vmem>>, vector<56x64xbf16>
    %cst = arith.constant dense<0.000000e+00> : vector<14x64xf32>
    %2 = tpu.matmul %0, %1, %cst {dimension_numbers = #tpu.dot_dimension_numbers<[1], [0], [0], [1], [0, 0, 1, 1], [], []>} : vector<14x56xbf16>, vector<56x64xbf16>, vector<14x64xf32> -> vector<14x64xf32>
    %c0_3 = arith.constant 0 : index
    %c0_4 = arith.constant 0 : index
    %3 = vector.load %arg2[%c0_3, %c0_4] : memref<32x14xbf16, #tpu.memory_space<vmem>>, vector<32x14xbf16>
    %4 = arith.truncf %2 : vector<14x64xf32> to vector<14x64xbf16>
    %cst_5 = arith.constant dense<0.000000e+00> : vector<32x64xf32>
    %5 = tpu.matmul %3, %4, %cst_5 {dimension_numbers = #tpu.dot_dimension_numbers<[1], [0], [0], [1], [0, 0, 1, 1], [], []>} : vector<32x14xbf16>, vector<14x64xbf16>, vector<32x64xf32> -> vector<32x64xf32>
    %c0_6 = arith.constant 0 : index
    %c0_7 = arith.constant 0 : index
    %6 = vector.load %arg1[%c0_6, %c0_7] : memref<32x64xbf16, #tpu.memory_space<vmem>>, vector<32x64xbf16>
    %c0_8 = arith.constant 0 : index
    %c0_9 = arith.constant 0 : index
    %7 = vector.load %arg9[%c0_8, %c0_9] : memref<32x128xbf16, #tpu.memory_space<vmem>>, vector<32x64xbf16>
    tpu.vector_store %arg9[%c0_8, %c0_9], %6 {strides = array<i32>} : memref<32x128xbf16, #tpu.memory_space<vmem>>, vector<32x64xbf16>,
    %8 = arith.truncf %5 : vector<32x64xf32> to vector<32x64xbf16>
    %c0_10 = arith.constant 0 : index
    %c64 = arith.constant 64 : index
    %9 = vector.load %arg9[%c0_10, %c64] : memref<32x128xbf16, #tpu.memory_space<vmem>>, vector<32x64xbf16>
    tpu.vector_store %arg9[%c0_10, %c64], %8 {strides = array<i32>} : memref<32x128xbf16, #tpu.memory_space<vmem>>, vector<32x64xbf16>,
    %c0_11 = arith.constant 0 : index
    %c0_12 = arith.constant 0 : index
    %10 = vector.load %arg9[%c0_11, %c0_12] : memref<32x128xbf16, #tpu.memory_space<vmem>>, vector<32x128xbf16>
    %c0_13 = arith.constant 0 : index
    %c0_14 = arith.constant 0 : index
    %c0_15 = arith.constant 0 : index
    %11 = vector.load %arg4[%c0_13, %c0_14, %c0_15] : memref<3x128x128xbf16, #tpu.memory_space<vmem>>, vector<1x128x128xbf16>
    %12 = vector.shape_cast %11 : vector<1x128x128xbf16> to vector<128x128xbf16>
    %cst_16 = arith.constant dense<0.000000e+00> : vector<32x128xf32>
    %13 = tpu.matmul %10, %12, %cst_16 {dimension_numbers = #tpu.dot_dimension_numbers<[1], [0], [0], [1], [0, 0, 1, 1], [], []>} : vector<32x128xbf16>, vector<128x128xbf16>, vector<32x128xf32> -> vector<32x128xf32>
    %c0_17 = arith.constant 0 : index
    %c0_18 = arith.constant 0 : index
    %c0_19 = arith.constant 0 : index
    %14 = vector.load %arg10[%c0_17, %c0_18, %c0_19] : memref<3x32x128xf32, #tpu.memory_space<vmem>>, vector<1x32x128xf32>
    %15 = vector.shape_cast %14 : vector<1x32x128xf32> to vector<32x128xf32>
    %16 = vector.shape_cast %13 : vector<32x128xf32> to vector<1x32x128xf32>
    tpu.vector_store %arg10[%c0_17, %c0_18, %c0_19], %16 {strides = array<i32>} : memref<3x32x128xf32, #tpu.memory_space<vmem>>, vector<1x32x128xf32>,
    %c1 = arith.constant 1 : index
    %c0_20 = arith.constant 0 : index
    %c0_21 = arith.constant 0 : index
    %17 = vector.load %arg4[%c1, %c0_20, %c0_21] : memref<3x128x128xbf16, #tpu.memory_space<vmem>>, vector<1x128x128xbf16>
    %18 = vector.shape_cast %17 : vector<1x128x128xbf16> to vector<128x128xbf16>
    %cst_22 = arith.constant dense<0.000000e+00> : vector<32x128xf32>
    %19 = tpu.matmul %10, %18, %cst_22 {dimension_numbers = #tpu.dot_dimension_numbers<[1], [0], [0], [1], [0, 0, 1, 1], [], []>} : vector<32x128xbf16>, vector<128x128xbf16>, vector<32x128xf32> -> vector<32x128xf32>
    %c1_23 = arith.constant 1 : index
    %c0_24 = arith.constant 0 : index
    %c0_25 = arith.constant 0 : index
    %20 = vector.load %arg10[%c1_23, %c0_24, %c0_25] : memref<3x32x128xf32, #tpu.memory_space<vmem>>, vector<1x32x128xf32>
    %21 = vector.shape_cast %20 : vector<1x32x128xf32> to vector<32x128xf32>
    %22 = vector.shape_cast %19 : vector<32x128xf32> to vector<1x32x128xf32>
    tpu.vector_store %arg10[%c1_23, %c0_24, %c0_25], %22 {strides = array<i32>} : memref<3x32x128xf32, #tpu.memory_space<vmem>>, vector<1x32x128xf32>,
    %c2 = arith.constant 2 : index
    %c0_26 = arith.constant 0 : index
    %c0_27 = arith.constant 0 : index
    %23 = vector.load %arg4[%c2, %c0_26, %c0_27] : memref<3x128x128xbf16, #tpu.memory_space<vmem>>, vector<1x128x128xbf16>
    %24 = vector.shape_cast %23 : vector<1x128x128xbf16> to vector<128x128xbf16>
    %cst_28 = arith.constant dense<0.000000e+00> : vector<32x128xf32>
    %25 = tpu.matmul %10, %24, %cst_28 {dimension_numbers = #tpu.dot_dimension_numbers<[1], [0], [0], [1], [0, 0, 1, 1], [], []>} : vector<32x128xbf16>, vector<128x128xbf16>, vector<32x128xf32> -> vector<32x128xf32>
    %c2_29 = arith.constant 2 : index
    %c0_30 = arith.constant 0 : index
    %c0_31 = arith.constant 0 : index
    %26 = vector.load %arg10[%c2_29, %c0_30, %c0_31] : memref<3x32x128xf32, #tpu.memory_space<vmem>>, vector<1x32x128xf32>
    %27 = vector.shape_cast %26 : vector<1x32x128xf32> to vector<32x128xf32>
    %28 = vector.shape_cast %25 : vector<32x128xf32> to vector<1x32x128xf32>
    tpu.vector_store %arg10[%c2_29, %c0_30, %c0_31], %28 {strides = array<i32>} : memref<3x32x128xf32, #tpu.memory_space<vmem>>, vector<1x32x128xf32>,
    %c0_32 = arith.constant 0 : index
    %c0_33 = arith.constant 0 : index
    %c0_34 = arith.constant 0 : index
    %29 = vector.load %arg10[%c0_32, %c0_33, %c0_34] : memref<3x32x128xf32, #tpu.memory_space<vmem>>, vector<1x14x128xf32>
    %30 = vector.shape_cast %29 : vector<1x14x128xf32> to vector<14x128xf32>
    %c1_35 = arith.constant 1 : index
    %c1_36 = arith.constant 1 : index
    %c0_37 = arith.constant 0 : index
    %31 = vector.load %arg10[%c1_35, %c1_36, %c0_37] : memref<3x32x128xf32, #tpu.memory_space<vmem>>, vector<1x14x128xf32>
    %32 = vector.shape_cast %31 : vector<1x14x128xf32> to vector<14x128xf32>
    %33 = arith.addf %30, %32 : vector<14x128xf32>
    %c2_38 = arith.constant 2 : index
    %c2_39 = arith.constant 2 : index
    %c0_40 = arith.constant 0 : index
    %34 = vector.load %arg10[%c2_38, %c2_39, %c0_40] : memref<3x32x128xf32, #tpu.memory_space<vmem>>, vector<1x14x128xf32>
    %35 = vector.shape_cast %34 : vector<1x14x128xf32> to vector<14x128xf32>
    %36 = arith.addf %33, %35 : vector<14x128xf32>
    %c0_41 = arith.constant 0 : index
    %c16 = arith.constant 16 : index
    %c0_42 = arith.constant 0 : index
    %37 = vector.load %arg10[%c0_41, %c16, %c0_42] : memref<3x32x128xf32, #tpu.memory_space<vmem>>, vector<1x14x128xf32>
    %38 = vector.shape_cast %37 : vector<1x14x128xf32> to vector<14x128xf32>
    %c1_43 = arith.constant 1 : index
    %c17 = arith.constant 17 : index
    %c0_44 = arith.constant 0 : index
    %39 = vector.load %arg10[%c1_43, %c17, %c0_44] : memref<3x32x128xf32, #tpu.memory_space<vmem>>, vector<1x14x128xf32>
    %40 = vector.shape_cast %39 : vector<1x14x128xf32> to vector<14x128xf32>
    %41 = arith.addf %38, %40 : vector<14x128xf32>
    %c2_45 = arith.constant 2 : index
    %c18 = arith.constant 18 : index
    %c0_46 = arith.constant 0 : index
    %42 = vector.load %arg10[%c2_45, %c18, %c0_46] : memref<3x32x128xf32, #tpu.memory_space<vmem>>, vector<1x14x128xf32>
    %43 = vector.shape_cast %42 : vector<1x14x128xf32> to vector<14x128xf32>
    %44 = arith.addf %41, %43 : vector<14x128xf32>
    %45 = tpu.concatenate %36, %44 in 0 : vector<14x128xf32>, vector<14x128xf32> -> vector<28x128xf32>
    %c0_47 = arith.constant 0 : index
    %c0_48 = arith.constant 0 : index
    %46 = vector.load %arg6[%c0_47, %c0_48] : memref<128x8xf32, #tpu.memory_space<vmem>>, vector<128x4xf32>
    %c0_49 = arith.constant 0 : index
    %c0_50 = arith.constant 0 : index
    %47 = vector.load %arg7[%c0_49, %c0_50] : memref<8x128xf32, #tpu.memory_space<vmem>>, vector<4x128xf32>
    %cst_51 = arith.constant dense<0.000000e+00> : vector<128xf32>
    %48 = vector.multi_reduction <add>, %45, %cst_51 [0] : vector<28x128xf32> to vector<128xf32>
    %49 = vector.shape_cast %48 : vector<128xf32> to vector<1x128xf32>
    %cst_52 = arith.constant dense<0.000000e+00> : vector<1x4xf32>
    %50 = tpu.matmul %49, %46, %cst_52 {dimension_numbers = #tpu.dot_dimension_numbers<[1], [0], [0], [1], [0, 0, 1, 1], [], []>} : vector<1x128xf32>, vector<128x4xf32>, vector<1x4xf32> -> vector<1x4xf32>
    %cst_53 = arith.constant 3.920000e+02 : f32
    %51 = vector.broadcast %cst_53 : f32 to vector<1x4xf32>
    %52 = arith.divf %50, %51 : vector<1x4xf32>
    %cst_54 = arith.constant dense<0.000000e+00> : vector<1x128xf32>
    %53 = tpu.matmul %52, %47, %cst_54 {dimension_numbers = #tpu.dot_dimension_numbers<[1], [0], [0], [1], [0, 0, 1, 1], [], []>} : vector<1x4xf32>, vector<4x128xf32>, vector<1x128xf32> -> vector<1x128xf32>
    %54 = vector.broadcast %53 : vector<1x128xf32> to vector<28x128xf32>
    %55 = arith.subf %45, %54 : vector<28x128xf32>
    %56 = arith.mulf %55, %55 : vector<28x128xf32>
    %cst_55 = arith.constant dense<0.000000e+00> : vector<128xf32>
    %57 = vector.multi_reduction <add>, %56, %cst_55 [0] : vector<28x128xf32> to vector<128xf32>
    %58 = vector.shape_cast %57 : vector<128xf32> to vector<1x128xf32>
    %cst_56 = arith.constant dense<0.000000e+00> : vector<1x4xf32>
    %59 = tpu.matmul %58, %46, %cst_56 {dimension_numbers = #tpu.dot_dimension_numbers<[1], [0], [0], [1], [0, 0, 1, 1], [], []>} : vector<1x128xf32>, vector<128x4xf32>, vector<1x4xf32> -> vector<1x4xf32>
    %cst_57 = arith.constant 3.920000e+02 : f32
    %60 = vector.broadcast %cst_57 : f32 to vector<1x4xf32>
    %61 = arith.divf %59, %60 : vector<1x4xf32>
    %cst_58 = arith.constant dense<0.000000e+00> : vector<1x128xf32>
    %62 = tpu.matmul %61, %47, %cst_58 {dimension_numbers = #tpu.dot_dimension_numbers<[1], [0], [0], [1], [0, 0, 1, 1], [], []>} : vector<1x4xf32>, vector<4x128xf32>, vector<1x128xf32> -> vector<1x128xf32>
    %cst_59 = arith.constant 9.99999974E-6 : f32
    %63 = vector.broadcast %cst_59 : f32 to vector<1x128xf32>
    %64 = arith.addf %62, %63 : vector<1x128xf32>
    %65 = math.rsqrt %64 : vector<1x128xf32>
    %66 = vector.broadcast %53 : vector<1x128xf32> to vector<28x128xf32>
    %67 = arith.subf %45, %66 : vector<28x128xf32>
    %68 = vector.broadcast %65 : vector<1x128xf32> to vector<28x128xf32>
    %69 = arith.mulf %67, %68 : vector<28x128xf32>
    %c4 = arith.constant 4 : index
    %c0_60 = arith.constant 0 : index
    %70 = vector.load %arg7[%c4, %c0_60] : memref<8x128xf32, #tpu.memory_space<vmem>>, vector<1x128xf32>
    %71 = vector.broadcast %70 : vector<1x128xf32> to vector<28x128xf32>
    %72 = arith.mulf %69, %71 : vector<28x128xf32>
    %c5 = arith.constant 5 : index
    %c0_61 = arith.constant 0 : index
    %73 = vector.load %arg7[%c5, %c0_61] : memref<8x128xf32, #tpu.memory_space<vmem>>, vector<1x128xf32>
    %74 = vector.broadcast %73 : vector<1x128xf32> to vector<28x128xf32>
    %75 = arith.addf %72, %74 : vector<28x128xf32>
    %cst_62 = arith.constant 0.000000e+00 : f32
    %76 = vector.broadcast %cst_62 : f32 to vector<28x128xf32>
    %77 = arith.maximumf %75, %76 : vector<28x128xf32>
    %78 = arith.truncf %77 : vector<28x128xf32> to vector<28x128xbf16>
    %c0_63 = arith.constant 0 : index
    %c0_64 = arith.constant 0 : index
    %79 = vector.load %arg12[%c0_63, %c0_64] : memref<28x128xbf16, #tpu.memory_space<vmem>>, vector<28x128xbf16>
    tpu.vector_store %arg12[%c0_63, %c0_64], %78 {strides = array<i32>} : memref<28x128xbf16, #tpu.memory_space<vmem>>, vector<28x128xbf16>,
    %c0_65 = arith.constant 0 : index
    %c0_66 = arith.constant 0 : index
    %80 = vector.load %arg12[%c0_65, %c0_66] : memref<28x128xbf16, #tpu.memory_space<vmem>>, vector<28x128xbf16>
    %c0_67 = arith.constant 0 : index
    %c0_68 = arith.constant 0 : index
    %c0_69 = arith.constant 0 : index
    %81 = vector.load %arg5[%c0_67, %c0_68, %c0_69] : memref<3x128x128xbf16, #tpu.memory_space<vmem>>, vector<1x128x128xbf16>
    %82 = vector.shape_cast %81 : vector<1x128x128xbf16> to vector<128x128xbf16>
    %cst_70 = arith.constant dense<0.000000e+00> : vector<28x128xf32>
    %83 = tpu.matmul %80, %82, %cst_70 {dimension_numbers = #tpu.dot_dimension_numbers<[1], [0], [0], [1], [0, 0, 1, 1], [], []>} : vector<28x128xbf16>, vector<128x128xbf16>, vector<28x128xf32> -> vector<28x128xf32>
    %c0_71 = arith.constant 0 : index
    %c0_72 = arith.constant 0 : index
    %c0_73 = arith.constant 0 : index
    %84 = vector.load %arg11[%c0_71, %c0_72, %c0_73] : memref<3x28x128xf32, #tpu.memory_space<vmem>>, vector<1x28x128xf32>
    %85 = vector.shape_cast %84 : vector<1x28x128xf32> to vector<28x128xf32>
    %86 = vector.shape_cast %83 : vector<28x128xf32> to vector<1x28x128xf32>
    tpu.vector_store %arg11[%c0_71, %c0_72, %c0_73], %86 {strides = array<i32>} : memref<3x28x128xf32, #tpu.memory_space<vmem>>, vector<1x28x128xf32>,
    %c1_74 = arith.constant 1 : index
    %c0_75 = arith.constant 0 : index
    %c0_76 = arith.constant 0 : index
    %87 = vector.load %arg5[%c1_74, %c0_75, %c0_76] : memref<3x128x128xbf16, #tpu.memory_space<vmem>>, vector<1x128x128xbf16>
    %88 = vector.shape_cast %87 : vector<1x128x128xbf16> to vector<128x128xbf16>
    %cst_77 = arith.constant dense<0.000000e+00> : vector<28x128xf32>
    %89 = tpu.matmul %80, %88, %cst_77 {dimension_numbers = #tpu.dot_dimension_numbers<[1], [0], [0], [1], [0, 0, 1, 1], [], []>} : vector<28x128xbf16>, vector<128x128xbf16>, vector<28x128xf32> -> vector<28x128xf32>
    %c1_78 = arith.constant 1 : index
    %c0_79 = arith.constant 0 : index
    %c0_80 = arith.constant 0 : index
    %90 = vector.load %arg11[%c1_78, %c0_79, %c0_80] : memref<3x28x128xf32, #tpu.memory_space<vmem>>, vector<1x28x128xf32>
    %91 = vector.shape_cast %90 : vector<1x28x128xf32> to vector<28x128xf32>
    %92 = vector.shape_cast %89 : vector<28x128xf32> to vector<1x28x128xf32>
    tpu.vector_store %arg11[%c1_78, %c0_79, %c0_80], %92 {strides = array<i32>} : memref<3x28x128xf32, #tpu.memory_space<vmem>>, vector<1x28x128xf32>,
    %c2_81 = arith.constant 2 : index
    %c0_82 = arith.constant 0 : index
    %c0_83 = arith.constant 0 : index
    %93 = vector.load %arg5[%c2_81, %c0_82, %c0_83] : memref<3x128x128xbf16, #tpu.memory_space<vmem>>, vector<1x128x128xbf16>
    %94 = vector.shape_cast %93 : vector<1x128x128xbf16> to vector<128x128xbf16>
    %cst_84 = arith.constant dense<0.000000e+00> : vector<28x128xf32>
    %95 = tpu.matmul %80, %94, %cst_84 {dimension_numbers = #tpu.dot_dimension_numbers<[1], [0], [0], [1], [0, 0, 1, 1], [], []>} : vector<28x128xbf16>, vector<128x128xbf16>, vector<28x128xf32> -> vector<28x128xf32>
    %c2_85 = arith.constant 2 : index
    %c0_86 = arith.constant 0 : index
    %c0_87 = arith.constant 0 : index
    %96 = vector.load %arg11[%c2_85, %c0_86, %c0_87] : memref<3x28x128xf32, #tpu.memory_space<vmem>>, vector<1x28x128xf32>
    %97 = vector.shape_cast %96 : vector<1x28x128xf32> to vector<28x128xf32>
    %98 = vector.shape_cast %95 : vector<28x128xf32> to vector<1x28x128xf32>
    tpu.vector_store %arg11[%c2_85, %c0_86, %c0_87], %98 {strides = array<i32>} : memref<3x28x128xf32, #tpu.memory_space<vmem>>, vector<1x28x128xf32>,
    %c0_88 = arith.constant 0 : index
    %c0_89 = arith.constant 0 : index
    %c0_90 = arith.constant 0 : index
    %99 = vector.load %arg11[%c0_88, %c0_89, %c0_90] : memref<3x28x128xf32, #tpu.memory_space<vmem>>, vector<1x12x128xf32>
    %100 = vector.shape_cast %99 : vector<1x12x128xf32> to vector<12x128xf32>
    %c1_91 = arith.constant 1 : index
    %c1_92 = arith.constant 1 : index
    %c0_93 = arith.constant 0 : index
    %101 = vector.load %arg11[%c1_91, %c1_92, %c0_93] : memref<3x28x128xf32, #tpu.memory_space<vmem>>, vector<1x12x128xf32>
    %102 = vector.shape_cast %101 : vector<1x12x128xf32> to vector<12x128xf32>
    %103 = arith.addf %100, %102 : vector<12x128xf32>
    %c2_94 = arith.constant 2 : index
    %c2_95 = arith.constant 2 : index
    %c0_96 = arith.constant 0 : index
    %104 = vector.load %arg11[%c2_94, %c2_95, %c0_96] : memref<3x28x128xf32, #tpu.memory_space<vmem>>, vector<1x12x128xf32>
    %105 = vector.shape_cast %104 : vector<1x12x128xf32> to vector<12x128xf32>
    %106 = arith.addf %103, %105 : vector<12x128xf32>
    %c0_97 = arith.constant 0 : index
    %c14 = arith.constant 14 : index
    %c0_98 = arith.constant 0 : index
    %107 = vector.load %arg11[%c0_97, %c14, %c0_98] : memref<3x28x128xf32, #tpu.memory_space<vmem>>, vector<1x12x128xf32>
    %108 = vector.shape_cast %107 : vector<1x12x128xf32> to vector<12x128xf32>
    %c1_99 = arith.constant 1 : index
    %c15 = arith.constant 15 : index
    %c0_100 = arith.constant 0 : index
    %109 = vector.load %arg11[%c1_99, %c15, %c0_100] : memref<3x28x128xf32, #tpu.memory_space<vmem>>, vector<1x12x128xf32>
    %110 = vector.shape_cast %109 : vector<1x12x128xf32> to vector<12x128xf32>
    %111 = arith.addf %108, %110 : vector<12x128xf32>
    %c2_101 = arith.constant 2 : index
    %c16_102 = arith.constant 16 : index
    %c0_103 = arith.constant 0 : index
    %112 = vector.load %arg11[%c2_101, %c16_102, %c0_103] : memref<3x28x128xf32, #tpu.memory_space<vmem>>, vector<1x12x128xf32>
    %113 = vector.shape_cast %112 : vector<1x12x128xf32> to vector<12x128xf32>
    %114 = arith.addf %111, %113 : vector<12x128xf32>
    %115 = tpu.concatenate %106, %114 in 0 : vector<12x128xf32>, vector<12x128xf32> -> vector<24x128xf32>
    %c0_104 = arith.constant 0 : index
    %c4_105 = arith.constant 4 : index
    %116 = vector.load %arg6[%c0_104, %c4_105] : memref<128x8xf32, #tpu.memory_space<vmem>>, vector<128x4xf32>
    %cst_106 = arith.constant dense<0.000000e+00> : vector<128xf32>
    %117 = vector.multi_reduction <add>, %115, %cst_106 [0] : vector<24x128xf32> to vector<128xf32>
    %118 = vector.shape_cast %117 : vector<128xf32> to vector<1x128xf32>
    %cst_107 = arith.constant dense<0.000000e+00> : vector<1x4xf32>
    %119 = tpu.matmul %118, %116, %cst_107 {dimension_numbers = #tpu.dot_dimension_numbers<[1], [0], [0], [1], [0, 0, 1, 1], [], []>} : vector<1x128xf32>, vector<128x4xf32>, vector<1x4xf32> -> vector<1x4xf32>
    %cst_108 = arith.constant 2.880000e+02 : f32
    %120 = vector.broadcast %cst_108 : f32 to vector<1x4xf32>
    %121 = arith.divf %119, %120 : vector<1x4xf32>
    %cst_109 = arith.constant dense<0.000000e+00> : vector<1x128xf32>
    %122 = tpu.matmul %121, %47, %cst_109 {dimension_numbers = #tpu.dot_dimension_numbers<[1], [0], [0], [1], [0, 0, 1, 1], [], []>} : vector<1x4xf32>, vector<4x128xf32>, vector<1x128xf32> -> vector<1x128xf32>
    %123 = vector.broadcast %122 : vector<1x128xf32> to vector<24x128xf32>
    %124 = arith.subf %115, %123 : vector<24x128xf32>
    %125 = arith.mulf %124, %124 : vector<24x128xf32>
    %cst_110 = arith.constant dense<0.000000e+00> : vector<128xf32>
    %126 = vector.multi_reduction <add>, %125, %cst_110 [0] : vector<24x128xf32> to vector<128xf32>
    %127 = vector.shape_cast %126 : vector<128xf32> to vector<1x128xf32>
    %cst_111 = arith.constant dense<0.000000e+00> : vector<1x4xf32>
    %128 = tpu.matmul %127, %116, %cst_111 {dimension_numbers = #tpu.dot_dimension_numbers<[1], [0], [0], [1], [0, 0, 1, 1], [], []>} : vector<1x128xf32>, vector<128x4xf32>, vector<1x4xf32> -> vector<1x4xf32>
    %cst_112 = arith.constant 2.880000e+02 : f32
    %129 = vector.broadcast %cst_112 : f32 to vector<1x4xf32>
    %130 = arith.divf %128, %129 : vector<1x4xf32>
    %cst_113 = arith.constant dense<0.000000e+00> : vector<1x128xf32>
    %131 = tpu.matmul %130, %47, %cst_113 {dimension_numbers = #tpu.dot_dimension_numbers<[1], [0], [0], [1], [0, 0, 1, 1], [], []>} : vector<1x4xf32>, vector<4x128xf32>, vector<1x128xf32> -> vector<1x128xf32>
    %cst_114 = arith.constant 9.99999974E-6 : f32
    %132 = vector.broadcast %cst_114 : f32 to vector<1x128xf32>
    %133 = arith.addf %131, %132 : vector<1x128xf32>
    %134 = math.rsqrt %133 : vector<1x128xf32>
    %135 = vector.broadcast %122 : vector<1x128xf32> to vector<24x128xf32>
    %136 = arith.subf %115, %135 : vector<24x128xf32>
    %137 = vector.broadcast %134 : vector<1x128xf32> to vector<24x128xf32>
    %138 = arith.mulf %136, %137 : vector<24x128xf32>
    %c6 = arith.constant 6 : index
    %c0_115 = arith.constant 0 : index
    %139 = vector.load %arg7[%c6, %c0_115] : memref<8x128xf32, #tpu.memory_space<vmem>>, vector<1x128xf32>
    %140 = vector.broadcast %139 : vector<1x128xf32> to vector<24x128xf32>
    %141 = arith.mulf %138, %140 : vector<24x128xf32>
    %c7 = arith.constant 7 : index
    %c0_116 = arith.constant 0 : index
    %142 = vector.load %arg7[%c7, %c0_116] : memref<8x128xf32, #tpu.memory_space<vmem>>, vector<1x128xf32>
    %143 = vector.broadcast %142 : vector<1x128xf32> to vector<24x128xf32>
    %144 = arith.addf %141, %143 : vector<24x128xf32>
    %cst_117 = arith.constant 0.000000e+00 : f32
    %145 = vector.broadcast %cst_117 : f32 to vector<24x128xf32>
    %146 = arith.maximumf %144, %145 : vector<24x128xf32>
    %c0_118 = arith.constant 0 : index
    %c0_119 = arith.constant 0 : index
    %147 = vector.load %arg8[%c0_118, %c0_119] : memref<24x128xf32, #tpu.memory_space<vmem>>, vector<24x128xf32>
    tpu.vector_store %arg8[%c0_118, %c0_119], %146 {strides = array<i32>} : memref<24x128xf32, #tpu.memory_space<vmem>>, vector<24x128xf32>,
    return
  }
}

</mosaic_0001>

<bundles_post_ra>
// kernel: tile.23
= control target key start
LH: loop header
LB: loop body
LE: loop exit
PB: predicated region body
PF: predicated region fallthrough
CT: control target
= control target key end

     0   :  { %s40_s0 = inlined_call_operand.vmem [shape: f32[4], index: 0, kind: input, shape index: {}]   ;;  %s41_s1 = inlined_call_operand.vmem [shape: f32[32,4], index: 1, kind: output, shape index: {}]  }
   0x1   :  { %v4_v0 = vld [vmem:[%s40_s0] ss:$0 sm:$0xff] }
   0x2   :  { %5 = vst [vmem:[%s41_s1] sm:$0xff] %v4_v0  ;;  %12 = vst [vmem:[%s41_s1 + $0x8] sm:$0xff] %v4_v0 }
   0x3   :  { %13 = vst [vmem:[%s41_s1 + $0x10] sm:$0xff] %v4_v0  ;;  %14 = vst [vmem:[%s41_s1 + $0x18] sm:$0xff] %v4_v0 }

// kernel: tile.24
= control target key start
LH: loop header
LB: loop body
LE: loop exit
PB: predicated region body
PF: predicated region fallthrough
CT: control target
= control target key end

     0   :  { %s259_s10 = smov 124   ;;  %s260_s11 = smov 116   ;;  %vm3_vm0 = vcmask 31744   ;;  %vm9_vm1 = vcmask 1048544   ;;  %vm15_vm2 = vcmask 1015744   ;;  %vm21_vm3 = vcmask 982944   ;;  %s399_s0 = inlined_call_operand.vmem [shape: f32[32,4], index: 0, kind: input, shape index: {}]   ;;  %s400_s1 = inlined_call_operand.vmem [shape: f32[1,128], index: 1, kind: output, shape index: {}]  }
   0x1   :  { %v197_v0 = vld [vmem:[%s399_s0 + $0x1f] sm:$0x1]   ;;  %v199_v1 = vld [vmem:[%s399_s0 + $0x1d] sm:$0x1]   ;;  %v198_v2 = vld [vmem:[%s399_s0 + $0x1e] sm:$0x1]  }
   0x2   :  { %7 = vrot.lane.b32.xlu0 %v197_v0, %s259_s10  ;;  %19 = vrot.lane.b32.xlu1 %v199_v1, %s260_s11  ;;  %v200_v3 = vld [vmem:[%s399_s0 + $0x1c] sm:$0x1]   ;;  %s261_s16 = smov 120   ;;  %s262_s17 = smov 112   ;;  %v201_v4 = vld [vmem:[%s399_s0 + $0x1b] sm:$0x1]  }
   0x3   :  { %v202_v5 = vld [vmem:[%s399_s0 + $0x1a] sm:$0x1]   ;;  %s263_s22 = smov 108   ;;  %s264_s23 = smov 104   ;;  %v203_v6 = vld [vmem:[%s399_s0 + $0x19] sm:$0x1]  }
   0x4   :  { %v204_v7 = vld [vmem:[%s399_s0 + $0x18] sm:$0x1]   ;;  %s265_s28 = smov 100   ;;  %s266_s29 = smov 96   ;;  %v205_v8 = vld [vmem:[%s399_s0 + $0x17] sm:$0x1]  }
   0x5   :  { %v206_v9 = vld [vmem:[%s399_s0 + $0x16] sm:$0x1]   ;;  %v2_v10 = vld [vmem:[%s399_s0] sm:$0x1]   ;;  %s267_s7 = smov 92   ;;  %s268_s8 = smov 88  }
   0x6   :  { %13 = vrot.lane.b32.xlu0 %v198_v2, %s261_s16  ;;  %25 = vrot.lane.b32.xlu1 %v200_v3, %s262_s17  ;;  %4 = vst.msk [vmem:[#allocation0] sm:$0x1] %vm3_vm0, %v2_v10   ;;  %v207_v11 = vld [vmem:[%s399_s0 + $0x15] sm:$0x1]   ;;  %v208_v12 = vld [vmem:[%s399_s0 + $0x14] sm:$0x1]  }
   0x7   :  { %s269_s13 = smov 84   ;;  %s270_s14 = smov 80   ;;  %v209_v13 = vld [vmem:[%s399_s0 + $0x13] sm:$0x1]   ;;  %v210_v14 = vld [vmem:[%s399_s0 + $0x12] sm:$0x1]  }
   0x8   :  { %s271_s19 = smov 76   ;;  %s272_s20 = smov 72   ;;  %v211_v15 = vld [vmem:[%s399_s0 + $0x11] sm:$0x1]   ;;  %v212_v16 = vld [vmem:[%s399_s0 + $0x10] sm:$0x1]  }
   0x9   :  { %s273_s25 = smov 68   ;;  %s274_s26 = smov 64   ;;  %v213_v17 = vld [vmem:[%s399_s0 + $0xf] sm:$0x1]   ;;  %v214_v18 = vld [vmem:[%s399_s0 + $0xe] sm:$0x1]  }
   0xa   :  { %31 = vrot.lane.b32.xlu0 %v201_v4, %s263_s22  ;;  %37 = vrot.lane.b32.xlu1 %v202_v5, %s264_s23  ;;  %s275_s2 = smov 60   ;;  %s276_s3 = smov 56   ;;  %v215_v19 = vld [vmem:[%s399_s0 + $0xd] sm:$0x1]   ;;  %v216_v20 = vld [vmem:[%s399_s0 + $0xc] sm:$0x1]  }
   0xb   :  { %s278_s9 = smov 48   ;;  %v217_v21 = vld [vmem:[%s399_s0 + $0xb] sm:$0x1]   ;;  %v218_v22 = vld [vmem:[%s399_s0 + $0xa] sm:$0x1]   ;;  %s280_s15 = smov 40  }
   0xc   :  { %v219_v23 = vld [vmem:[%s399_s0 + $0x9] sm:$0x1]   ;;  %v220_v24 = vld [vmem:[%s399_s0 + $0x8] sm:$0x1]   ;;  %s282_s21 = smov 32   ;;  %s284_s27 = smov 24  }
   0xd   :  { %v221_v25 = vld [vmem:[%s399_s0 + $0x7] sm:$0x1]   ;;  %v222_v26 = vld [vmem:[%s399_s0 + $0x6] sm:$0x1]   ;;  %v223_v27 = vld [vmem:[%s399_s0 + $0x5] sm:$0x1]  }
   0xe   :  { %43 = vrot.lane.b32.xlu0 %v203_v6, %s265_s28  ;;  %49 = vrot.lane.b32.xlu1 %v204_v7, %s266_s29  ;;  %v224_v28 = vld [vmem:[%s399_s0 + $0x4] sm:$0x1]   ;;  %s286_s4 = smov 16   ;;  %v225_v29 = vld [vmem:[%s399_s0 + $0x3] sm:$0x1]   ;;  %s288_s10 = smov 8  }
   0xf   :  { %v226_v30 = vld [vmem:[%s399_s0 + $0x2] sm:$0x1]   ;;  %v227_v31 = vld [vmem:[%s399_s0 + $0x1] sm:$0x1]   ;;  %s289_s0 = smov 4   ;;  %vm27_vm4 = vcmask 950144  }
  0x10   :  { %vm33_vm5 = vcmask 917344   ;;  %vm39_vm6 = vcmask 884544   ;;  %vm45_vm7 = vcmask 851744   ;;  %vm51_vm8 = vcmask 818944  }
  0x11   :  { %vm57_vm9 = vcmask 786144   ;;  %vm63_vm10 = vcmask 753344   ;;  %vm69_vm11 = vcmask 720544   ;;  %vm75_vm12 = vcmask 687744  }
  0x12   :  { %55 = vrot.lane.b32.xlu0 %v205_v8, %s267_s7  ;;  %61 = vrot.lane.b32.xlu1 %v206_v9, %s268_s8  ;;  %s277_s8 = smov 52   ;;  %vm81_vm13 = vcmask 654944   ;;  %vm87_vm14 = vcmask 622144   ;;  %vm93_vm15 = vcmask 589344   ;;  %vm99_vm0 = vcmask 556544  }
  0x16   :  { %67 = vrot.lane.b32.xlu0 %v207_v11, %s269_s13  ;;  %73 = vrot.lane.b32.xlu1 %v208_v12, %s270_s14  ;;  %s279_s14 = smov 44  }
  0x1a   :  { %79 = vrot.lane.b32.xlu0 %v209_v13, %s271_s19  ;;  %85 = vrot.lane.b32.xlu1 %v210_v14, %s272_s20  ;;  %s281_s20 = smov 36  }
  0x1e   :  { %91 = vrot.lane.b32.xlu0 %v211_v15, %s273_s25  ;;  %97 = vrot.lane.b32.xlu1 %v212_v16, %s274_s26  ;;  %s283_s26 = smov 28  }
  0x22   :  { %103 = vrot.lane.b32.xlu0 %v213_v17, %s275_s2  ;;  %109 = vrot.lane.b32.xlu1 %v214_v18, %s276_s3  ;;  %s285_s3 = smov 20  }
  0x26   :  { %115 = vrot.lane.b32.xlu0 %v215_v19, %s277_s8  ;;  %121 = vrot.lane.b32.xlu1 %v216_v20, %s278_s9  ;;  %s287_s9 = smov 12  }
  0x2a   :  { %127 = vrot.lane.b32.xlu0 %v217_v21, %s279_s14  ;;  %133 = vrot.lane.b32.xlu1 %v218_v22, %s280_s15 }
  0x2e   :  { %139 = vrot.lane.b32.xlu0 %v219_v23, %s281_s20  ;;  %145 = vrot.lane.b32.xlu1 %v220_v24, %s282_s21 }
  0x32   :  { %151 = vrot.lane.b32.xlu0 %v221_v25, %s283_s26  ;;  %157 = vrot.lane.b32.xlu1 %v222_v26, %s284_s27 }
  0x36   :  { %163 = vrot.lane.b32.xlu0 %v223_v27, %s285_s3  ;;  %169 = vrot.lane.b32.xlu1 %v224_v28, %s286_s4 }
  0x3a   :  { %175 = vrot.lane.b32.xlu0 %v225_v29, %s287_s9  ;;  %181 = vrot.lane.b32.xlu1 %v226_v30, %s288_s10 }
  0x3e   :  { %187 = vrot.lane.b32.xlu0 %v227_v31, %s289_s0 }
  0x74   :  { %v8_v32 = vpop.permute.xlu0 %7   ;;  %v20_v33 = vpop.permute.xlu1 %19  }
  0x75   :  { %10 = vst.msk [vmem:[#allocation0] sm:$0x1] %vm9_vm1, %v8_v32   ;;  %vm105_vm1 = vcmask 523744  }
  0x78   :  { %v14_v34 = vpop.permute.xlu0 %13   ;;  %v26_v35 = vpop.permute.xlu1 %25  }
  0x79   :  { %16 = vst.msk [vmem:[#allocation0] sm:$0x1] %vm15_vm2, %v14_v34   ;;  %vm111_vm2 = vcmask 490944  }
  0x7a   :  { %22 = vst.msk [vmem:[#allocation0] sm:$0x1] %vm21_vm3, %v20_v33   ;;  %vm117_vm3 = vcmask 458144  }
  0x7b   :  { %28 = vst.msk [vmem:[#allocation0] sm:$0x1] %vm27_vm4, %v26_v35   ;;  %vm123_vm4 = vcmask 425344  }
  0x7c   :  { %v32_v36 = vpop.permute.xlu0 %31   ;;  %v38_v37 = vpop.permute.xlu1 %37  }
  0x7d   :  { %34 = vst.msk [vmem:[#allocation0] sm:$0x1] %vm33_vm5, %v32_v36   ;;  %vm129_vm5 = vcmask 392544  }
  0x7e   :  { %40 = vst.msk [vmem:[#allocation0] sm:$0x1] %vm39_vm6, %v38_v37   ;;  %vm135_vm6 = vcmask 359744  }
  0x80   :  { %v44_v38 = vpop.permute.xlu0 %43   ;;  %v50_v39 = vpop.permute.xlu1 %49  }
  0x81   :  { %46 = vst.msk [vmem:[#allocation0] sm:$0x1] %vm45_vm7, %v44_v38   ;;  %vm141_vm7 = vcmask 326944  }
  0x82   :  { %52 = vst.msk [vmem:[#allocation0] sm:$0x1] %vm51_vm8, %v50_v39   ;;  %vm147_vm8 = vcmask 294144  }
  0x84   :  { %v56_v40 = vpop.permute.xlu0 %55   ;;  %v62_v41 = vpop.permute.xlu1 %61  }
  0x85   :  { %58 = vst.msk [vmem:[#allocation0] sm:$0x1] %vm57_vm9, %v56_v40   ;;  %vm153_vm9 = vcmask 261344  }
  0x86   :  { %64 = vst.msk [vmem:[#allocation0] sm:$0x1] %vm63_vm10, %v62_v41   ;;  %vm159_vm10 = vcmask 228544  }
  0x88   :  { %v68_v42 = vpop.permute.xlu0 %67   ;;  %v74_v43 = vpop.permute.xlu1 %73  }
  0x89   :  { %70 = vst.msk [vmem:[#allocation0] sm:$0x1] %vm69_vm11, %v68_v42   ;;  %vm165_vm11 = vcmask 195744  }
  0x8a   :  { %76 = vst.msk [vmem:[#allocation0] sm:$0x1] %vm75_vm12, %v74_v43   ;;  %vm171_vm12 = vcmask 162944  }
  0x8c   :  { %v80_v44 = vpop.permute.xlu0 %79   ;;  %v86_v45 = vpop.permute.xlu1 %85  }
  0x8d   :  { %82 = vst.msk [vmem:[#allocation0] sm:$0x1] %vm81_vm13, %v80_v44   ;;  %vm177_vm13 = vcmask 130144  }
  0x8e   :  { %88 = vst.msk [vmem:[#allocation0] sm:$0x1] %vm87_vm14, %v86_v45   ;;  %vm183_vm14 = vcmask 97344  }
  0x90   :  { %v92_v46 = vpop.permute.xlu0 %91   ;;  %v98_v47 = vpop.permute.xlu1 %97  }
  0x91   :  { %94 = vst.msk [vmem:[#allocation0] sm:$0x1] %vm93_vm15, %v92_v46   ;;  %vm189_vm15 = vcmask 64544  }
  0x92   :  { %100 = vst.msk [vmem:[#allocation0] sm:$0x1] %vm99_vm0, %v98_v47  }
  0x94   :  { %v104_v48 = vpop.permute.xlu0 %103   ;;  %v110_v49 = vpop.permute.xlu1 %109  }
  0x95   :  { %106 = vst.msk [vmem:[#allocation0] sm:$0x1] %vm105_vm1, %v104_v48  }
  0x96   :  { %112 = vst.msk [vmem:[#allocation0] sm:$0x1] %vm111_vm2, %v110_v49  }
  0x98   :  { %v116_v50 = vpop.permute.xlu0 %115   ;;  %v122_v51 = vpop.permute.xlu1 %121  }
  0x99   :  { %118 = vst.msk [vmem:[#allocation0] sm:$0x1] %vm117_vm3, %v116_v50  }
  0x9a   :  { %124 = vst.msk [vmem:[#allocation0] sm:$0x1] %vm123_vm4, %v122_v51  }
  0x9c   :  { %v128_v52 = vpop.permute.xlu0 %127   ;;  %v134_v53 = vpop.permute.xlu1 %133  }
  0x9d   :  { %130 = vst.msk [vmem:[#allocation0] sm:$0x1] %vm129_vm5, %v128_v52  }
  0x9e   :  { %136 = vst.msk [vmem:[#allocation0] sm:$0x1] %vm135_vm6, %v134_v53  }
  0xa0   :  { %v140_v54 = vpop.permute.xlu0 %139   ;;  %v146_v55 = vpop.permute.xlu1 %145  }
  0xa1   :  { %142 = vst.msk [vmem:[#allocation0] sm:$0x1] %vm141_vm7, %v140_v54  }
  0xa2   :  { %148 = vst.msk [vmem:[#allocation0] sm:$0x1] %vm147_vm8, %v146_v55  }
  0xa4   :  { %v152_v56 = vpop.permute.xlu0 %151   ;;  %v158_v57 = vpop.permute.xlu1 %157  }
  0xa5   :  { %154 = vst.msk [vmem:[#allocation0] sm:$0x1] %vm153_vm9, %v152_v56  }
  0xa6   :  { %160 = vst.msk [vmem:[#allocation0] sm:$0x1] %vm159_vm10, %v158_v57  }
  0xa8   :  { %v164_v58 = vpop.permute.xlu0 %163   ;;  %v170_v59 = vpop.permute.xlu1 %169  }
  0xa9   :  { %166 = vst.msk [vmem:[#allocation0] sm:$0x1] %vm165_vm11, %v164_v58  }
  0xaa   :  { %172 = vst.msk [vmem:[#allocation0] sm:$0x1] %vm171_vm12, %v170_v59  }
  0xac   :  { %v176_v60 = vpop.permute.xlu0 %175   ;;  %v182_v61 = vpop.permute.xlu1 %181  }
  0xad   :  { %178 = vst.msk [vmem:[#allocation0] sm:$0x1] %vm177_vm13, %v176_v60  }
  0xae   :  { %184 = vst.msk [vmem:[#allocation0] sm:$0x1] %vm183_vm14, %v182_v61  }
  0xb0   :  { %v188_v62 = vpop.permute.xlu0 %187  }
  0xb1   :  { %190 = vst.msk [vmem:[#allocation0] sm:$0x1] %vm189_vm15, %v188_v62  }
  0xb8   :  { %v194_v63 = vld [vmem:[#allocation0] sm:$0x1] }
  0xb9   :  { %196 = vst [vmem:[%s400_s1] sm:$0x1] %v194_v63 }

// kernel: up_forward.1
= control target key start
LH: loop header
LB: loop body
LE: loop exit
PB: predicated region body
PF: predicated region fallthrough
CT: control target
= control target key end

     0   :  { %v2627_v0 = vmov 0.0   ;;  %vm2628_vm0 = vmmov 0   ;;  %vm69_vm1 = vcmask 1043456   ;;  %vm65_vm2 = vcmask 457728   ;;  %s2629_s28 = smov 64   ;;  %s3121_s3 = inlined_call_operand.vmem [shape: bf16[56,64], index: 3, kind: input, shape index: {}]   ;;  %s3122_s0 = inlined_call_operand.vmem [shape: bf16[14,56], index: 0, kind: input, shape index: {}]   ;;  %s3123_s2 = inlined_call_operand.vmem [shape: bf16[32,14], index: 2, kind: input, shape index: {}]   ;;  %s3124_s4 = inlined_call_operand.vmem [shape: bf16[3,128,128], index: 4, kind: input, shape index: {}]   ;;  %s3125_s1 = inlined_call_operand.vmem [shape: bf16[32,64], index: 1, kind: input, shape index: {}]   ;;  %s3126_s6 = inlined_call_operand.vmem [shape: f32[128,8], index: 6, kind: input, shape index: {}]   ;;  %s3127_s7 = inlined_call_operand.vmem [shape: f32[8,128], index: 7, kind: input, shape index: {}]   ;;  %s3128_s5 = inlined_call_operand.vmem [shape: bf16[3,128,128], index: 5, kind: input, shape index: {}]   ;;  %s3129_s8 = inlined_call_operand.vmem [shape: f32[24,128], index: 8, kind: output, shape index: {}]  }
   0x1   :  { %2124 = vmatprep.subr.bf16.mxu0 %v2627_v0  ;;  %v2564_v1 = vld [vmem:[%s3121_s3] sm:$0xff]   ;;  %2132 = vmatprep.mubr.msk.bf16.mxu0 %vm2628_vm0, %v2627_v0  ;;  %v2565_v2 = vld [vmem:[%s3121_s3 + $0x8] sm:$0xff]   ;;  %v2566_v3 = vld [vmem:[%s3121_s3 + $0x10] sm:$0xff]   ;;  %vm129_vm3 = vcmask 113664   ;;  %vm136_vm4 = vcmask 1046528   ;;  %vm205_vm5 = vcmask 523264  }
   0x2   :  { %2125 = vmatpush3.bf16.msra.mxu0 %v2564_v1  ;;  %v2567_v4 = vld [vmem:[%s3121_s3 + $0x18] ss:$0 sps:$4 sm:$0xff]   ;;  %v2568_v6 = vld [vmem:[%s3122_s0] sm:$0x7f]   ;;  %v2570_v14 = vld [vmem:[%s3123_s2 + $0x8] sm:$0xff]   ;;  %vm218_vm6 = vcmask 1048064  }
   0x3   :  { %2126 = vmatprep.subr.bf16.mxu0 %v2627_v0  ;;  %v71_v5 = vsel %vm69_vm1, %v2567_v4, 0  ;;  %v2569_v7 = vld [vmem:[%s3123_s2] sm:$0xff]   ;;  %v2573_v17 = vld [vmem:[%s3124_s4 + $0x8] sm:$0xff]   ;;  %v2575_v19 = vld [vmem:[%s3124_s4 + $0x10] sm:$0xff]   ;;  %v2630_v54 = vmov 0.0|0.0   ;;  %vm600_vm7 = vcmask 1045504  }
   0x4   :  { %2138 = vmatprep.mubr.msk.bf16.mxu1 %vm129_vm3, %v2569_v7  ;;  %v2571_v15 = vld [vmem:[%s3124_s4] sm:$0xff]   ;;  %v2574_v18 = vld [vmem:[%s3124_s4 + $0x48] sm:$0xff]   ;;  %v2576_v20 = vld [vmem:[%s3124_s4 + $0x50] sm:$0xff]   ;;  %vm707_vm8 = vcmask 31744  }
   0x5   :  { %v2572_v16 = vld [vmem:[%s3124_s4 + $0x40] sm:$0xff]   ;;  %v2577_v21 = vld [vmem:[%s3124_s4 + $0x18] sm:$0xff]   ;;  %v2581_v26 = vld [vmem:[%s3124_s4 + $0x28] sm:$0xff]  }
   0x6   :  { %2127 = vmatpush3.bf16.msra.mxu0 %v2565_v2  ;;  %v2578_v22 = vld [vmem:[%s3124_s4 + $0x58] sm:$0xff]   ;;  %v2579_v23 = vld [vmem:[%s3124_s4 + $0x20] sm:$0xff]   ;;  %v2583_v27 = vld [vmem:[%s3124_s4 + $0x68] sm:$0xff]  }
   0x7   :  { %2128 = vmatprep.subr.bf16.mxu0 %v2627_v0  ;;  %v2580_v24 = vld [vmem:[%s3124_s4 + $0x60] sm:$0xff]   ;;  %v2584_v28 = vld [vmem:[%s3124_s4 + $0x30] sm:$0xff]   ;;  %v2585_v29 = vld [vmem:[%s3125_s1 + $0x8] sm:$0xff]  }
   0x8   :  { %v2582_v25 = vld [vmem:[%s3125_s1] sm:$0xff]   ;;  %207 = vst.msk [vmem:[#allocation2 + $0x8] sm:$0xff] %vm205_vm5, %v2585_v29  ;;  %v2586_v30 = vld [vmem:[%s3124_s4 + $0x70] sm:$0xff]   ;;  %v2587_v31 = vld [vmem:[%s3124_s4 + $0x38] sm:$0xff]  }
   0x9   :  { %206 = vst.msk [vmem:[#allocation2] sm:$0xff] %vm205_vm5, %v2582_v25  ;;  %v2588_v32 = vld [vmem:[%s3124_s4 + $0x78] sm:$0xff]   ;;  %v2589_v35 = vld [vmem:[%s3124_s4 + $0x80] sm:$0xff]   ;;  %v2590_v43 = vld [vmem:[%s3124_s4 + $0x88] sm:$0xff]  }
   0xa   :  { %2129 = vmatpush3.bf16.msra.mxu0 %v2566_v3  ;;  %v2591_v45 = vld [vmem:[%s3124_s4 + $0x90] sm:$0xff]   ;;  %v2592_v46 = vld [vmem:[%s3124_s4 + $0x98] sm:$0xff]   ;;  %v2593_v47 = vld [vmem:[%s3124_s4 + $0xa0] sm:$0xff]  }
   0xb   :  { %2130 = vmatprep.subr.bf16.mxu0 %v2627_v0  ;;  %v2594_v48 = vld [vmem:[%s3124_s4 + $0xa8] sm:$0xff]   ;;  %v2595_v49 = vld [vmem:[%s3124_s4 + $0xb0] sm:$0xff]   ;;  %v2596_v50 = vld [vmem:[%s3124_s4 + $0xb8] sm:$0xff]  }
   0xc   :  { %v2793_v51 = vld [vmem:[%s3126_s6] sm:$0xff]  ;;  %v2798_v52 = vld [vmem:[%s3126_s6 + $0x8] sm:$0xff]  ;;  %v2810_v55 = vld [vmem:[%s3126_s6 + $0x10] sm:$0xff] }
   0xd   :  { %v2802_v53 = vpack.c.bf16 %v2798_v52, %v2793_v51  ;;  %v2815_v56 = vld [vmem:[%s3126_s6 + $0x18] sm:$0xff]  ;;  %v2820_v57 = vld [vmem:[%s3126_s6 + $0x20] sm:$0xff]  ;;  %v2829_v59 = vld [vmem:[%s3126_s6 + $0x28] sm:$0xff] }
   0xe   :  { %2131 = vmatpush3.bf16.msra.mxu0 %v71_v5  ;;  %v2824_v58 = vpack.c.bf16 %v2815_v56, %v2810_v55  ;;  %v2834_v60 = vpack.c.bf16 %v2829_v59, %v2820_v57  ;;  %v2840_v61 = vld [vmem:[%s3126_s6 + $0x30] sm:$0xff]  ;;  %v2845_v62 = vld [vmem:[%s3126_s6 + $0x38] sm:$0xff]  ;;  %v2856_v1 = vld [vmem:[%s3126_s6 + $0x40] sm:$0xff] }
   0xf   :  { %2162 = vmatprep.subr.bf16.mxu0 %v2572_v16  ;;  %v2850_v63 = vpack.c.bf16 %v2845_v62, %v2840_v61  ;;  %v2861_v2 = vld [vmem:[%s3126_s6 + $0x48] sm:$0xff]  ;;  %v2872_v4 = vld [vmem:[%s3126_s6 + $0x50] sm:$0xff]  ;;  %v2877_v5 = vld [vmem:[%s3126_s6 + $0x58] sm:$0xff] }
  0x10   :  { %v2866_v3 = vpack.c.bf16 %v2861_v2, %v2856_v1  ;;  %v2888_v7 = vld [vmem:[%s3126_s6 + $0x60] sm:$0xff] }
  0x11   :  { %2133 = vmatmul.mubr.msk.bf16.vlgmr.msra.gmra.mrb[0].mxu0 %vm65_vm2, %v2568_v6  ;;  %v2882_v6 = vpack.c.bf16 %v2877_v5, %v2872_v4 }
  0x12   :  { %2163 = vmatpush3.bf16.msra.mxu0 %v2572_v16 }
  0x13   :  { %2164 = vmatprep.subr.bf16.mxu0 %v2574_v18 }
  0x16   :  { %2165 = vmatpush3.bf16.msra.mxu0 %v2574_v18 }
  0x17   :  { %2166 = vmatprep.subr.bf16.mxu0 %v2576_v20 }
  0x1a   :  { %2167 = vmatpush3.bf16.msra.mxu0 %v2576_v20 }
  0x1b   :  { %2168 = vmatprep.subr.bf16.mxu0 %v2578_v22 }
  0x1e   :  { %2169 = vmatpush3.bf16.msra.mxu0 %v2578_v22 }
  0x1f   :  { %2170 = vmatprep.subr.bf16.mxu0 %v2580_v24 }
  0x22   :  { %2171 = vmatpush3.bf16.msra.mxu0 %v2580_v24 }
  0x23   :  { %2172 = vmatprep.subr.bf16.mxu0 %v2583_v27 }
  0x26   :  { %2173 = vmatpush3.bf16.msra.mxu0 %v2583_v27 }
  0x27   :  { %2174 = vmatprep.subr.bf16.mxu0 %v2586_v30 }
  0x2a   :  { %2175 = vmatpush3.bf16.msra.mxu0 %v2586_v30 }
  0x2b   :  { %2176 = vmatprep.subr.bf16.mxu0 %v2588_v32 }
  0x2e   :  { %2177 = vmatpush3.bf16.msra.mxu0 %v2588_v32 }
  0x2f   :  { %2422 = vmatprep.subr.bf16.mxu0 %v2630_v54 }
  0xe4   :  { %v107_v8 = vpop.f32.mrb[0].mxu0 }
  0xe5   :  { %v2134_v9 = vpop.f32.mrb[1].mxu0 }
  0xe6   :  { %v110_v10 = vpop.f32.mrb[2].mxu0 }
  0xe7   :  { %v118_v11 = vpack.c.bf16 %v110_v10, %v107_v8  ;;  %v2135_v12 = vpop.f32.mrb[3].mxu0  ;;  %v2893_v8 = vld [vmem:[%s3126_s6 + $0x68] sm:$0xff]  ;;  %v2904_v10 = vld [vmem:[%s3126_s6 + $0x70] sm:$0xff] }
  0xe8   :  { %v2898_v9 = vpack.c.bf16 %v2893_v8, %v2888_v7 }
  0xe9   :  { %2518 = vmatprep.subr.msk.bf16.mxu1 %vm136_vm4, %v118_v11  ;;  %v138_v13 = vsel %vm136_vm4, %v118_v11, 0  ;;  %v2909_v11 = vld [vmem:[%s3126_s6 + $0x78] sm:$0xff] }
  0xea   :  { %2137 = vmatpush3.bf16.msra.mxu1 %v138_v13  ;;  %v2914_v12 = vpack.c.bf16 %v2909_v11, %v2904_v10  ;;  %v2922_v13 = vld [vmem:[%s3127_s7] sm:$0xf] }
  0xeb   :  { %2142 = vmatprep.subr.bf16.mxu1 %v2571_v15 }
  0xed   :  { %2139 = vmatmul.mubr.msk.bf16.vlgmr.msra.gmra.mrb[0].mxu1 %vm129_vm3, %v2570_v14 }
  0xee   :  { %2143 = vmatpush3.bf16.msra.mxu1 %v2571_v15 }
  0xef   :  { %2144 = vmatprep.subr.bf16.mxu1 %v2573_v17 }
  0xf2   :  { %2145 = vmatpush3.bf16.msra.mxu1 %v2573_v17 }
  0xf3   :  { %2146 = vmatprep.subr.bf16.mxu1 %v2575_v19 }
  0xf6   :  { %2147 = vmatpush3.bf16.msra.mxu1 %v2575_v19 }
  0xf7   :  { %2148 = vmatprep.subr.bf16.mxu1 %v2577_v21 }
  0xfa   :  { %2149 = vmatpush3.bf16.msra.mxu1 %v2577_v21 }
  0xfb   :  { %2150 = vmatprep.subr.bf16.mxu1 %v2579_v23 }
  0xfe   :  { %2151 = vmatpush3.bf16.msra.mxu1 %v2579_v23 }
  0xff   :  { %2152 = vmatprep.subr.bf16.mxu1 %v2581_v26 }
 0x102   :  { %2153 = vmatpush3.bf16.msra.mxu1 %v2581_v26 }
 0x103   :  { %2154 = vmatprep.subr.bf16.mxu1 %v2584_v28 }
 0x106   :  { %2155 = vmatpush3.bf16.msra.mxu1 %v2584_v28 }
 0x107   :  { %2156 = vmatprep.subr.bf16.mxu1 %v2587_v31 }
 0x10a   :  { %2157 = vmatpush3.bf16.msra.mxu1 %v2587_v31 }
 0x10b   :  { %2182 = vmatprep.subr.bf16.mxu1 %v2589_v35 }
 0x1c0   :  { %v2140_v33 = vpop.f32.mrb[0].mxu1 }
 0x1c1   :  { %v174_v34 = vpop.f32.mrb[1].mxu1 }
 0x1c2   :  { %v2141_v36 = vpop.f32.mrb[2].mxu1 }
 0x1c3   :  { %v209_v37 = vpack.c.bf16 %v2141_v36, %v2140_v33  ;;  %v177_v38 = vpop.f32.mrb[3].mxu1 }
 0x1c4   :  { %v208_v39 = vpack.c.bf16 %v177_v38, %v174_v34 }
 0x1c6   :  { %212 = vrot.lane.b32.xlu0 %v208_v39, %s2629_s28 }
 0x1ca   :  { %214 = vrot.lane.b32.xlu0 %v209_v37, %s2629_s28  ;;  %s2631_s28 = smov 124  }
 0x238   :  { %v213_v40 = vpop.permute.xlu0 %212 }
 0x239   :  { %219 = vst.msk [vmem:[#allocation2] sm:$0xff] %vm218_vm6, %v213_v40 }
 0x23c   :  { %v215_v41 = vpop.permute.xlu0 %214 }
 0x23d   :  { %220 = vst.msk [vmem:[#allocation2 + $0x8] sm:$0xff] %vm218_vm6, %v215_v41 }
 0x240   :  { %v221_v42 = vld [vmem:[#allocation2] sm:$0xff] }
 0x241   :  { %2158 = vmatprep.mubr.bf16.mxu1 %v221_v42  ;;  %2178 = vmatprep.mubr.bf16.mxu0 %v221_v42 }
 0x244   :  { %v222_v44 = vld [vmem:[#allocation2 + $0x8] sm:$0xff] }
 0x245   :  { %2159 = vmatmul.mubr.bf16.vlgmr.msra.gmra.mrb[4].mxu1 %v222_v44  ;;  %2179 = vmatmul.mubr.bf16.vlgmr.msra.gmra.mrb[4].mxu0 %v222_v44 }
 0x246   :  { %2183 = vmatpush3.bf16.msra.mxu1 %v2589_v35  ;;  %2198 = vmatprep.mubr.bf16.mxu1 %v221_v42 }
 0x247   :  { %2184 = vmatprep.subr.bf16.mxu1 %v2590_v43  ;;  %2234 = vmatprep.mubr.msk.f32.mxu0 %vm2628_vm0, %v2627_v0 }
 0x248   :  { %2424 = vmatpush3.bf16.msra.mxu0 %v2802_v53 }
 0x249   :  { %2425 = vmatprep.subr.bf16.mxu0 %v2630_v54 }
 0x24a   :  { %2185 = vmatpush3.bf16.msra.mxu1 %v2590_v43 }
 0x24b   :  { %2186 = vmatprep.subr.bf16.mxu1 %v2591_v45 }
 0x24c   :  { %2427 = vmatpush3.bf16.msra.mxu0 %v2824_v58 }
 0x24d   :  { %2428 = vmatprep.subr.bf16.mxu0 %v2630_v54 }
 0x24e   :  { %2187 = vmatpush3.bf16.msra.mxu1 %v2591_v45 }
 0x24f   :  { %2188 = vmatprep.subr.bf16.mxu1 %v2592_v46 }
 0x250   :  { %2430 = vmatpush3.bf16.msra.mxu0 %v2834_v60 }
 0x251   :  { %2431 = vmatprep.subr.bf16.mxu0 %v2630_v54 }
 0x252   :  { %2189 = vmatpush3.bf16.msra.mxu1 %v2592_v46 }
 0x253   :  { %2190 = vmatprep.subr.bf16.mxu1 %v2593_v47 }
 0x254   :  { %2433 = vmatpush3.bf16.msra.mxu0 %v2850_v63 }
 0x255   :  { %2434 = vmatprep.subr.bf16.mxu0 %v2630_v54 }
 0x256   :  { %2191 = vmatpush3.bf16.msra.mxu1 %v2593_v47 }
 0x257   :  { %2192 = vmatprep.subr.bf16.mxu1 %v2594_v48 }
 0x258   :  { %2436 = vmatpush3.bf16.msra.mxu0 %v2866_v3 }
 0x259   :  { %2437 = vmatprep.subr.bf16.mxu0 %v2630_v54 }
 0x25a   :  { %2193 = vmatpush3.bf16.msra.mxu1 %v2594_v48 }
 0x25b   :  { %2194 = vmatprep.subr.bf16.mxu1 %v2595_v49 }
 0x25c   :  { %2439 = vmatpush3.bf16.msra.mxu0 %v2882_v6 }
 0x25d   :  { %2440 = vmatprep.subr.bf16.mxu0 %v2630_v54 }
 0x25e   :  { %2195 = vmatpush3.bf16.msra.mxu1 %v2595_v49 }
 0x25f   :  { %2196 = vmatprep.subr.bf16.mxu1 %v2596_v50 }
 0x260   :  { %2442 = vmatpush3.bf16.msra.mxu0 %v2898_v9 }
 0x261   :  { %2443 = vmatprep.subr.bf16.mxu0 %v2630_v54 }
 0x262   :  { %2197 = vmatpush3.bf16.msra.mxu1 %v2596_v50 }
 0x263   :  { %2237 = vmatprep.subr.mxu1 %v2627_v0 }
 0x264   :  { %2445 = vmatpush3.bf16.msra.mxu0 %v2914_v12 }
 0x265   :  { %2199 = vmatmul.mubr.bf16.vlgmr.msra.gmra.mrb[8].mxu1 %v222_v44  ;;  %2277 = vmatprep.subr.mxu0 %v2627_v0 }
 0x266   :  { %2239 = vmatprep.mubr.msk.f32.mxu1 %vm2628_vm0, %v2627_v0  ;;  %2238 = vmatpush3.msk.msra.mxu1 %vm69_vm1, %v2922_v13 }
 0x267   :  { %2446 = vmatprep.subr.bf16.mxu1 %v2630_v54 }
 0x318   :  { %v2160_v14 = vpop.f32.mrb[4].mxu1  ;;  %v2180_v15 = vpop.f32.mrb[4].mxu0 }
 0x319   :  { %457 = vst [vmem:[#allocation3 + $0x30] sm:$0xff] %v2180_v15  ;;  %v321_v16 = vpop.f32.mrb[5].mxu1  ;;  %v439_v17 = vpop.f32.mrb[5].mxu0 }
 0x31a   :  { %455 = vst [vmem:[#allocation3 + $0x20] sm:$0xff] %v439_v17  ;;  %v2161_v18 = vpop.f32.mrb[6].mxu1  ;;  %v2181_v19 = vpop.f32.mrb[6].mxu0 }
 0x31b   :  { %339 = vst [vmem:[#allocation3 + $0x18] sm:$0xff] %v2161_v18  ;;  %458 = vst [vmem:[#allocation3 + $0x38] sm:$0xff] %v2181_v19  ;;  %v324_v20 = vpop.f32.mrb[7].mxu1  ;;  %v442_v21 = vpop.f32.mrb[7].mxu0 }
 0x31c   :  { %337 = vst [vmem:[#allocation3 + $0x8] sm:$0xff] %v324_v20  ;;  %456 = vst [vmem:[#allocation3 + $0x28] sm:$0xff] %v442_v21 }
 0x322   :  { %v589_v26 = vld [vmem:[#allocation3 + $0x18] sm:$0x3f] }
 0x323   :  { %v590_v27 = vld [vmem:[#allocation3 + $0x31] sm:$0xff]  ;;  %v591_v28 = vld [vmem:[#allocation3 + $0x39] sm:$0x3f]  ;;  %v579_v29 = vld [vmem:[#allocation3 + $0x8] sm:$0x3f] }
 0x324   :  { %v581_v30 = vld [vmem:[#allocation3 + $0x29] sm:$0x3f]  ;;  %v580_v31 = vld [vmem:[#allocation3 + $0x21] sm:$0xff]  ;;  %v592_v32 = vadd.f32 %v2160_v14, %v590_v27  ;;  %v593_v33 = vadd.f32 %v591_v28, %v589_v26 }
 0x325   :  { %v583_v34 = vadd.f32 %v581_v30, %v579_v29  ;;  %v582_v41 = vadd.f32 %v580_v31, %v321_v16 }
 0x338   :  { %v2200_v22 = vpop.f32.mrb[8].mxu1 }
 0x339   :  { %576 = vst [vmem:[#allocation3 + $0x50] sm:$0xff] %v2200_v22  ;;  %v558_v23 = vpop.f32.mrb[9].mxu1 }
 0x33a   :  { %574 = vst [vmem:[#allocation3 + $0x40] sm:$0xff] %v558_v23  ;;  %v2201_v24 = vpop.f32.mrb[10].mxu1 }
 0x33b   :  { %577 = vst [vmem:[#allocation3 + $0x58] sm:$0xff] %v2201_v24  ;;  %v561_v25 = vpop.f32.mrb[11].mxu1 }
 0x33c   :  { %575 = vst [vmem:[#allocation3 + $0x48] sm:$0xff] %v561_v25 }
 0x342   :  { %v594_v35 = vld [vmem:[#allocation3 + $0x52] sm:$0xff]  ;;  %v595_v36 = vld [vmem:[#allocation3 + $0x5a] sm:$0x3f] }
 0x343   :  { %v584_v37 = vld [vmem:[#allocation3 + $0x42] sm:$0xff]  ;;  %v585_v38 = vld [vmem:[#allocation3 + $0x4a] sm:$0x3f]  ;;  %v596_v39 = vadd.f32 %v594_v35, %v592_v32  ;;  %v597_v40 = vadd.f32 %v595_v36, %v593_v33 }
 0x344   :  { %v587_v42 = vadd.f32 %v585_v38, %v583_v34  ;;  %v586_v45 = vadd.f32 %v584_v37, %v582_v41 }
 0x345   :  { %v601_v43 = vrot.slane %v596_v39, 2  ;;  %v602_v44 = vrot.slane %v597_v40, 2 }
 0x347   :  { %v607_v46 = vsel %vm600_vm7, %v587_v42, %v601_v43  ;;  %v603_v48 = vsel %vm600_vm7, %v601_v43, %v602_v44  ;;  %v627_v50 = vsel %vm69_vm1, %v602_v44, 0.0  ;;  %v2597_v43 = vld [vmem:[%s3128_s5] sm:$0xff]  }
 0x348   :  { %v625_v47 = vadd.f32 %v607_v46, %v586_v45 }
 0x34a   :  { %v626_v49 = vadd.f32 %v625_v47, %v603_v48  ;;  %v2601_v47 = vld [vmem:[%s3128_s5 + $0x10] sm:$0xff]  }
 0x34c   :  { %v628_v14 = vadd.f32 %v627_v50, %v626_v49  ;;  %v2603_v49 = vld [vmem:[%s3128_s5 + $0x18] sm:$0xff]  }
 0x34d   :  { %v2604_v50 = vld [vmem:[%s3128_s5 + $0x58] sm:$0xff]  }
 0x34e   :  { %v629_v15 = vrot.slane %v628_v14, 4 }
 0x350   :  { %v630_v17 = vadd.f32 %v629_v15, %v628_v14  ;;  %v2605_v14 = vld [vmem:[%s3128_s5 + $0x20] sm:$0xff]  }
 0x351   :  { %v2606_v15 = vld [vmem:[%s3128_s5 + $0x60] sm:$0xff]  }
 0x352   :  { %v631_v18 = vrot.slane %v630_v17, 2 }
 0x354   :  { %v632_v19 = vadd.f32 %v631_v18, %v630_v17  ;;  %v2607_v17 = vld [vmem:[%s3128_s5 + $0x28] sm:$0xff]  }
 0x355   :  { %v2608_v18 = vld [vmem:[%s3128_s5 + $0x68] sm:$0xff]  }
 0x356   :  { %v633_v20 = vrot.slane %v632_v19, 1 }
 0x358   :  { %v634_v21 = vadd.f32 %v633_v20, %v632_v19  ;;  %v2609_v19 = vld [vmem:[%s3128_s5 + $0x30] sm:$0xff]  }
 0x359   :  { %v2610_v20 = vld [vmem:[%s3128_s5 + $0x70] sm:$0xff]  }
 0x35a   :  { %2235 = vmatmul.mubr.f32.vlgmr.msra.gmra.mrb[8].mxu0 %v634_v21  ;;  %v2611_v21 = vld [vmem:[%s3128_s5 + $0x38] sm:$0xff]  }
 0x35b   :  { %2278 = vmatpush3.msk.msra.mxu0 %vm69_vm1, %v2922_v13  ;;  %2279 = vmatprep.mubr.msk.f32.mxu0 %vm2628_vm0, %v2627_v0 }
 0x35c   :  { %2282 = vmatprep.subr.bf16.mxu0 %v2597_v43 }
 0x42d   :  { %v701_v16 = vpop.f32.mrb[8].mxu0 }
 0x42e   :  { %v706_v22 = vmul.f32 0.0025510204, %v701_v16  ;;  %v2236_v23 = vpop.f32.mrb[9].mxu0  ;;  %v2612_v16 = vld [vmem:[%s3128_s5 + $0x78] sm:$0xff]  }
 0x42f   :  { %v2524_v23 = vpack.i.bf16 %v2798_v52, %v2793_v51  ;;  %v2554_v51 = vpack.i.bf16 %v2893_v8, %v2888_v7  ;;  %v2549_v52 = vpack.i.bf16 %v2877_v5, %v2872_v4  ;;  %v1902_v8 = vld [vmem:[%s3127_s7 + $0x5] ss:$0 sm:$0xff] }
 0x430   :  { %2240 = vmatmul.mubr.msk.f32.vlgmr.msra.gmra.mrb[12].mxu1 %vm707_vm8, %v706_v22  ;;  %v2614_v22 = vld [vmem:[%s3128_s5 + $0x80] sm:$0xff]  }
 0x431   :  { %2448 = vmatpush3.bf16.msra.mxu1 %v2802_v53  ;;  %2274 = vmatprep.mubr.msk.f32.mxu1 %vm2628_vm0, %v2627_v0  ;;  %v784_v53 = vlaneseq }
 0x432   :  { %2449 = vmatprep.subr.bf16.mxu1 %v2630_v54  ;;  %2525 = vrot.lane.b32.xlu1 %v2524_v23, %s2631_s28 }
 0x435   :  { %2451 = vmatpush3.bf16.msra.mxu1 %v2824_v58  ;;  %v785_v58 = vshrl.u32 %v784_v53, 7  ;;  %v2534_v53 = vpack.i.bf16 %v2829_v59, %v2820_v57 }
 0x436   :  { %2452 = vmatprep.subr.bf16.mxu1 %v2630_v54 }
 0x437   :  { %2535 = vrot.lane.b32.xlu0 %v2534_v53, %s2631_s28 }
 0x439   :  { %2454 = vmatpush3.bf16.msra.mxu1 %v2834_v60  ;;  %v2950_v60 = vsub.s32 0, %v785_v58  ;;  %v2529_v58 = vpack.i.bf16 %v2815_v56, %v2810_v55  ;;  %v2559_v55 = vpack.i.bf16 %v2909_v11, %v2904_v10 }
 0x43a   :  { %2455 = vmatprep.subr.bf16.mxu1 %v2630_v54 }
 0x43b   :  { %2530 = vrot.lane.b32.xlu1 %v2529_v58, %s2631_s28 }
 0x43d   :  { %2457 = vmatpush3.bf16.msra.mxu1 %v2850_v63 }
 0x43e   :  { %2458 = vmatprep.subr.bf16.mxu1 %v2630_v54 }
 0x441   :  { %2460 = vmatpush3.bf16.msra.mxu1 %v2866_v3 }
 0x442   :  { %2461 = vmatprep.subr.bf16.mxu1 %v2630_v54 }
 0x445   :  { %2463 = vmatpush3.bf16.msra.mxu1 %v2882_v6 }
 0x446   :  { %2464 = vmatprep.subr.bf16.mxu1 %v2630_v54 }
 0x449   :  { %2466 = vmatpush3.bf16.msra.mxu1 %v2898_v9 }
 0x44a   :  { %2467 = vmatprep.subr.bf16.mxu1 %v2630_v54 }
 0x44d   :  { %2469 = vmatpush3.bf16.msra.mxu1 %v2914_v12 }
 0x503   :  { %v780_v63 = vpop.f32.mrb[12].mxu1 }
 0x504   :  { %v787_v24 = vrot.slane %v780_v63, %v2950_v60  ;;  %v2241_v3 = vpop.f32.mrb[13].mxu1  ;;  %v2544_v63 = vpack.i.bf16 %v2861_v2, %v2856_v1 }
 0x506   :  { %v2953_v25 = vsub.f32 %v586_v45, %v787_v24  ;;  %v2955_v26 = vsub.f32 %v607_v46, %v787_v24  ;;  %v2957_v6 = vsub.f32 %v603_v48, %v787_v24  ;;  %v2959_v27 = vsub.f32 %v602_v44, %v787_v24  ;;  %v2598_v44 = vld [vmem:[%s3128_s5 + $0x40] sm:$0xff]   ;;  %v2599_v45 = vld [vmem:[%s3128_s5 + $0x8] sm:$0xff]   ;;  %v2602_v48 = vld [vmem:[%s3128_s5 + $0x50] sm:$0xff]   ;;  %2545 = vrot.lane.b32.xlu0 %v2544_v63, %s2631_s28 }
 0x507   :  { %2302 = vmatprep.subr.bf16.mxu1 %v2598_v44  ;;  %v2600_v46 = vld [vmem:[%s3128_s5 + $0x48] sm:$0xff]   ;;  %v2539_v24 = vpack.i.bf16 %v2845_v62, %v2840_v61  ;;  %v1901_v62 = vld [vmem:[%s3127_s7 + $0x4] ss:$0 sm:$0xff] }
 0x508   :  { %v792_v9 = vmul.f32 %v2953_v25, %v2953_v25  ;;  %v793_v12 = vmul.f32 %v2955_v26, %v2955_v26  ;;  %v795_v28 = vmul.f32 %v2959_v27, %v2959_v27  ;;  %v794_v29 = vmul.f32 %v2957_v6, %v2957_v6 }
 0x509   :  { %2540 = vrot.lane.b32.xlu1 %v2539_v24, %s2631_s28 }
 0x50a   :  { %v796_v30 = vadd.f32 %v793_v12, %v792_v9  ;;  %v798_v32 = vsel %vm69_vm1, %v795_v28, 0.0  ;;  %2555 = vrot.lane.b32.xlu0 %v2554_v51, %s2631_s28 }
 0x50c   :  { %v797_v31 = vadd.f32 %v796_v30, %v794_v29 }
 0x50d   :  { %2550 = vrot.lane.b32.xlu1 %v2549_v52, %s2631_s28 }
 0x50e   :  { %v799_v33 = vadd.f32 %v798_v32, %v797_v31 }
 0x510   :  { %v800_v34 = vrot.slane %v799_v33, 4 }
 0x511   :  { %2560 = vrot.lane.b32.xlu1 %v2559_v55, %s2631_s28 }
 0x512   :  { %v801_v35 = vadd.f32 %v800_v34, %v799_v33 }
 0x514   :  { %v802_v36 = vrot.slane %v801_v35, 2 }
 0x516   :  { %v803_v37 = vadd.f32 %v802_v36, %v801_v35 }
 0x518   :  { %v804_v38 = vrot.slane %v803_v37, 1 }
 0x51a   :  { %v805_v39 = vadd.f32 %v804_v38, %v803_v37  ;;  %v2617_v37 = vld [vmem:[%s3128_s5 + $0x90] sm:$0xff]   ;;  %v2618_v38 = vld [vmem:[%s3128_s5 + $0x98] sm:$0xff]  }
 0x51c   :  { %2275 = vmatmul.mubr.f32.vlgmr.msra.gmra.mrb[14].mxu1 %v805_v39  ;;  %v2619_v39 = vld [vmem:[%s3128_s5 + $0xa0] sm:$0xff]  }
 0x51d   :  { %2303 = vmatpush3.bf16.msra.mxu1 %v2598_v44 }
 0x51e   :  { %2304 = vmatprep.subr.bf16.mxu1 %v2600_v46 }
 0x521   :  { %2305 = vmatpush3.bf16.msra.mxu1 %v2600_v46 }
 0x522   :  { %2306 = vmatprep.subr.bf16.mxu1 %v2602_v48 }
 0x525   :  { %2307 = vmatpush3.bf16.msra.mxu1 %v2602_v48 }
 0x526   :  { %2308 = vmatprep.subr.bf16.mxu1 %v2604_v50 }
 0x529   :  { %2309 = vmatpush3.bf16.msra.mxu1 %v2604_v50 }
 0x52a   :  { %2310 = vmatprep.subr.bf16.mxu1 %v2606_v15 }
 0x52d   :  { %2311 = vmatpush3.bf16.msra.mxu1 %v2606_v15 }
 0x52e   :  { %2312 = vmatprep.subr.bf16.mxu1 %v2608_v18 }
 0x531   :  { %2313 = vmatpush3.bf16.msra.mxu1 %v2608_v18 }
 0x532   :  { %2314 = vmatprep.subr.bf16.mxu1 %v2610_v20 }
 0x535   :  { %2315 = vmatpush3.bf16.msra.mxu1 %v2610_v20 }
 0x536   :  { %2316 = vmatprep.subr.bf16.mxu1 %v2612_v16 }
 0x539   :  { %2317 = vmatpush3.bf16.msra.mxu1 %v2612_v16 }
 0x53a   :  { %2470 = vmatprep.subr.bf16.mxu1 %v2630_v54 }
 0x5ef   :  { %v872_v40 = vpop.f32.mrb[14].mxu1 }
 0x5f0   :  { %v876_v41 = vmul.f32 0.0025510204, %v872_v40  ;;  %v2276_v42 = vpop.f32.mrb[15].mxu1  ;;  %v2620_v40 = vld [vmem:[%s3128_s5 + $0xa8] sm:$0xff]  }
 0x5f1   :  { %v2622_v42 = vld [vmem:[%s3128_s5 + $0xb8] sm:$0xff]  }
 0x5f2   :  { %2280 = vmatmul.mubr.msk.f32.vlgmr.msra.gmra.mrb[10].mxu0 %vm707_vm8, %v876_v41  ;;  %v2621_v41 = vld [vmem:[%s3128_s5 + $0xb0] sm:$0xff]  }
 0x5f3   :  { %2283 = vmatpush3.bf16.msra.mxu0 %v2597_v43  ;;  %v2526_v43 = vpop.permute.xlu1 %2525 }
 0x5f4   :  { %2284 = vmatprep.subr.bf16.mxu0 %v2599_v45  ;;  %v2528_v44 = vunpack.i.h.bf16 %v2526_v43 }
 0x5f7   :  { %2285 = vmatpush3.bf16.msra.mxu0 %v2599_v45  ;;  %v2527_v45 = vunpack.i.l.bf16 %v2526_v43 }
 0x5f8   :  { %2286 = vmatprep.subr.bf16.mxu0 %v2601_v47 }
 0x5f9   :  { %v2471_v46 = vpack.c.bf16 %v2528_v44, %v2527_v45 }
 0x5fb   :  { %2287 = vmatpush3.bf16.msra.mxu0 %v2601_v47  ;;  %v2531_v47 = vpop.permute.xlu1 %2530 }
 0x5fc   :  { %2288 = vmatprep.subr.bf16.mxu0 %v2603_v49  ;;  %v2533_v48 = vunpack.i.h.bf16 %v2531_v47 }
 0x5ff   :  { %2289 = vmatpush3.bf16.msra.mxu0 %v2603_v49  ;;  %v2532_v49 = vunpack.i.l.bf16 %v2531_v47  ;;  %v2541_v18 = vpop.permute.xlu1 %2540 }
 0x600   :  { %2290 = vmatprep.subr.bf16.mxu0 %v2605_v14  ;;  %v2542_v20 = vunpack.i.l.bf16 %v2541_v18 }
 0x601   :  { %v2474_v50 = vpack.c.bf16 %v2533_v48, %v2532_v49 }
 0x603   :  { %2291 = vmatpush3.bf16.msra.mxu0 %v2605_v14  ;;  %v2536_v14 = vpop.permute.xlu0 %2535  ;;  %v2551_v58 = vpop.permute.xlu1 %2550 }
 0x604   :  { %2292 = vmatprep.subr.bf16.mxu0 %v2607_v17  ;;  %v2538_v15 = vunpack.i.h.bf16 %v2536_v14  ;;  %v2553_v24 = vunpack.i.h.bf16 %v2551_v58  ;;  %v2552_v51 = vunpack.i.l.bf16 %v2551_v58 }
 0x606   :  { %v2486_v55 = vpack.c.bf16 %v2553_v24, %v2552_v51 }
 0x607   :  { %2293 = vmatpush3.bf16.msra.mxu0 %v2607_v17  ;;  %v2537_v17 = vunpack.i.l.bf16 %v2536_v14  ;;  %v2546_v16 = vpop.permute.xlu0 %2545 }
 0x608   :  { %2294 = vmatprep.subr.bf16.mxu0 %v2609_v19  ;;  %v2548_v23 = vunpack.i.h.bf16 %v2546_v16  ;;  %v2547_v53 = vunpack.i.l.bf16 %v2546_v16 }
 0x60a   :  { %v2483_v63 = vpack.c.bf16 %v2548_v23, %v2547_v53 }
 0x60b   :  { %2295 = vmatpush3.bf16.msra.mxu0 %v2609_v19  ;;  %v2543_v19 = vunpack.i.h.bf16 %v2541_v18  ;;  %v2556_v52 = vpop.permute.xlu0 %2555 }
 0x60c   :  { %2296 = vmatprep.subr.bf16.mxu0 %v2611_v21 }
 0x60f   :  { %2297 = vmatpush3.bf16.msra.mxu0 %v2611_v21  ;;  %v2477_v21 = vpack.c.bf16 %v2538_v15, %v2537_v17 }
 0x610   :  { %2322 = vmatprep.subr.bf16.mxu0 %v2614_v22 }
 0x6c5   :  { %v946_v56 = vpop.f32.mrb[10].mxu0 }
 0x6c6   :  { %v947_v57 = vadd.f32 1e-05, %v946_v56  ;;  %v2281_v59 = vpop.f32.mrb[11].mxu0  ;;  %v2558_v56 = vunpack.i.h.bf16 %v2556_v52 }
 0x6c7   :  { %v2561_v59 = vpop.permute.xlu1 %2560 }
 0x6c8   :  { %2623 = vrsqrt.f32 %v947_v57  ;;  %v2557_v57 = vunpack.i.l.bf16 %v2556_v52 }
 0x6d2   :  { %v2624_v1 = vpop.eup %2623 }
 0x6d3   :  { %v954_v61 = vrot.slane %v2624_v1, %v2950_v60  ;;  %v2489_v1 = vpack.c.bf16 %v2558_v56, %v2557_v57 }
 0x6d5   :  { %v955_v2 = vmul.f32 %v954_v61, %v2953_v25  ;;  %v956_v4 = vmul.f32 %v954_v61, %v2955_v26  ;;  %v957_v5 = vmul.f32 %v954_v61, %v2957_v6  ;;  %v958_v7 = vmul.f32 %v954_v61, %v2959_v27  ;;  %v2616_v27 = vld [vmem:[%s3128_s5 + $0x88] sm:$0xff]  }
 0x6d6   :  { %v2563_v61 = vunpack.i.h.bf16 %v2561_v59 }
 0x6d7   :  { %v964_v10 = vmul.f32 %v1901_v62, %v955_v2  ;;  %v965_v11 = vmul.f32 %v1901_v62, %v956_v4  ;;  %v966_v3 = vmul.f32 %v1901_v62, %v957_v5  ;;  %v967_v9 = vmul.f32 %v1901_v62, %v958_v7 }
 0x6d8   :  { %v2562_v62 = vunpack.i.l.bf16 %v2561_v59 }
 0x6d9   :  { %v973_v12 = vadd.f32 %v1902_v8, %v964_v10  ;;  %v974_v28 = vadd.f32 %v1902_v8, %v965_v11  ;;  %v975_v29 = vadd.f32 %v1902_v8, %v966_v3  ;;  %v976_v30 = vadd.f32 %v1902_v8, %v967_v9 }
 0x6da   :  { %v2492_v2 = vpack.c.bf16 %v2563_v61, %v2562_v62 }
 0x6db   :  { %v977_v31 = vmax.f32 %v973_v12, 0.0  ;;  %v978_v25 = vmax.f32 %v974_v28, 0.0  ;;  %v979_v32 = vmax.f32 %v975_v29, 0.0  ;;  %v980_v26 = vmax.f32 %v976_v30, 0.0 }
 0x6dd   :  { %v1973_v33 = vpack.c.bf16 %v979_v32, %v979_v32  ;;  %v1974_v6 = vpack.c.bf16 %v980_v26, %v980_v26  ;;  %v1978_v34 = vpack.c.bf16 %v978_v25, %v977_v31 }
 0x6df   :  { %1979 = vst [vmem:[#allocation5] sm:$0xff] %v1978_v34   ;;  %999 = vst [vmem:[#allocation5 + $0x8] sm:$0xf] %v1973_v33 }
 0x6e0   :  { %1000 = vst [vmem:[#allocation5 + $0xc] sm:$0x3] %v1974_v6 }
 0x6e6   :  { %v2613_v35 = vld [vmem:[#allocation5] sm:$0xff]  }
 0x6e7   :  { %v2615_v36 = vld [vmem:[#allocation5 + $0x8] sm:$0x3f]   ;;  %2298 = vmatprep.mubr.bf16.mxu0 %v2613_v35  ;;  %2318 = vmatprep.mubr.bf16.mxu1 %v2613_v35 }
 0x6e8   :  { %2299 = vmatmul.mubr.bf16.vlgmr.msra.gmra.mrb[12].mxu0 %v2615_v36  ;;  %2319 = vmatmul.mubr.bf16.vlgmr.msra.gmra.mrb[16].mxu1 %v2615_v36 }
 0x6e9   :  { %2323 = vmatpush3.bf16.msra.mxu0 %v2614_v22  ;;  %2338 = vmatprep.mubr.bf16.mxu0 %v2613_v35  ;;  %v2480_v22 = vpack.c.bf16 %v2543_v19, %v2542_v20 }
 0x6ea   :  { %2324 = vmatprep.subr.bf16.mxu0 %v2616_v27  ;;  %2374 = vmatprep.mubr.msk.f32.mxu1 %vm2628_vm0, %v2627_v0 }
 0x6eb   :  { %2472 = vmatpush3.bf16.msra.mxu1 %v2471_v46 }
 0x6ec   :  { %2473 = vmatprep.subr.bf16.mxu1 %v2630_v54 }
 0x6ed   :  { %2325 = vmatpush3.bf16.msra.mxu0 %v2616_v27 }
 0x6ee   :  { %2326 = vmatprep.subr.bf16.mxu0 %v2617_v37 }
 0x6ef   :  { %2475 = vmatpush3.bf16.msra.mxu1 %v2474_v50 }
 0x6f0   :  { %2476 = vmatprep.subr.bf16.mxu1 %v2630_v54 }
 0x6f1   :  { %2327 = vmatpush3.bf16.msra.mxu0 %v2617_v37 }
 0x6f2   :  { %2328 = vmatprep.subr.bf16.mxu0 %v2618_v38 }
 0x6f3   :  { %2478 = vmatpush3.bf16.msra.mxu1 %v2477_v21 }
 0x6f4   :  { %2479 = vmatprep.subr.bf16.mxu1 %v2630_v54 }
 0x6f5   :  { %2329 = vmatpush3.bf16.msra.mxu0 %v2618_v38 }
 0x6f6   :  { %2330 = vmatprep.subr.bf16.mxu0 %v2619_v39 }
 0x6f7   :  { %2481 = vmatpush3.bf16.msra.mxu1 %v2480_v22 }
 0x6f8   :  { %2482 = vmatprep.subr.bf16.mxu1 %v2630_v54 }
 0x6f9   :  { %2331 = vmatpush3.bf16.msra.mxu0 %v2619_v39 }
 0x6fa   :  { %2332 = vmatprep.subr.bf16.mxu0 %v2620_v40 }
 0x6fb   :  { %2484 = vmatpush3.bf16.msra.mxu1 %v2483_v63 }
 0x6fc   :  { %2485 = vmatprep.subr.bf16.mxu1 %v2630_v54 }
 0x6fd   :  { %2333 = vmatpush3.bf16.msra.mxu0 %v2620_v40 }
 0x6fe   :  { %2334 = vmatprep.subr.bf16.mxu0 %v2621_v41 }
 0x6ff   :  { %2487 = vmatpush3.bf16.msra.mxu1 %v2486_v55 }
 0x700   :  { %2488 = vmatprep.subr.bf16.mxu1 %v2630_v54 }
 0x701   :  { %2335 = vmatpush3.bf16.msra.mxu0 %v2621_v41 }
 0x702   :  { %2336 = vmatprep.subr.bf16.mxu0 %v2622_v42 }
 0x703   :  { %2490 = vmatpush3.bf16.msra.mxu1 %v2489_v1 }
 0x704   :  { %2491 = vmatprep.subr.bf16.mxu1 %v2630_v54 }
 0x705   :  { %2337 = vmatpush3.bf16.msra.mxu0 %v2622_v42 }
 0x706   :  { %2494 = vmatprep.subr.bf16.mxu0 %v2630_v54 }
 0x707   :  { %2493 = vmatpush3.bf16.msra.mxu1 %v2492_v2 }
 0x708   :  { %2339 = vmatmul.mubr.bf16.vlgmr.msra.gmra.mrb[16].mxu0 %v2615_v36  ;;  %2377 = vmatprep.subr.mxu1 %v2627_v0 }
 0x709   :  { %2414 = vmatprep.mubr.msk.f32.mxu0 %vm2628_vm0, %v2627_v0  ;;  %2496 = vmatpush3.bf16.msra.mxu0 %v2471_v46 }
 0x70a   :  { %2497 = vmatprep.subr.bf16.mxu0 %v2630_v54 }
 0x70d   :  { %2499 = vmatpush3.bf16.msra.mxu0 %v2474_v50 }
 0x70e   :  { %2500 = vmatprep.subr.bf16.mxu0 %v2630_v54 }
 0x711   :  { %2502 = vmatpush3.bf16.msra.mxu0 %v2477_v21 }
 0x712   :  { %2503 = vmatprep.subr.bf16.mxu0 %v2630_v54 }
 0x715   :  { %2505 = vmatpush3.bf16.msra.mxu0 %v2480_v22 }
 0x716   :  { %2506 = vmatprep.subr.bf16.mxu0 %v2630_v54 }
 0x719   :  { %2508 = vmatpush3.bf16.msra.mxu0 %v2483_v63 }
 0x71a   :  { %2509 = vmatprep.subr.bf16.mxu0 %v2630_v54 }
 0x71d   :  { %2511 = vmatpush3.bf16.msra.mxu0 %v2486_v55 }
 0x71e   :  { %2512 = vmatprep.subr.bf16.mxu0 %v2630_v54 }
 0x721   :  { %2514 = vmatpush3.bf16.msra.mxu0 %v2489_v1 }
 0x722   :  { %2515 = vmatprep.subr.bf16.mxu0 %v2630_v54 }
 0x725   :  { %2517 = vmatpush3.bf16.msra.mxu0 %v2492_v2 }
 0x7bb   :  { %v2300_v4 = vpop.f32.mrb[12].mxu0  ;;  %v2320_v5 = vpop.f32.mrb[16].mxu1 }
 0x7bc   :  { %1132 = vst [vmem:[#allocation4 + $0x10] sm:$0xff] %v2300_v4  ;;  %1251 = vst [vmem:[#allocation4 + $0x30] sm:$0xff] %v2320_v5  ;;  %v1115_v7 = vpop.f32.mrb[13].mxu0  ;;  %v1233_v8 = vpop.f32.mrb[17].mxu1 }
 0x7bd   :  { %1249 = vst [vmem:[#allocation4 + $0x20] sm:$0xff] %v1233_v8  ;;  %v2301_v10 = vpop.f32.mrb[14].mxu0  ;;  %v2321_v11 = vpop.f32.mrb[18].mxu1 }
 0x7be   :  { %1133 = vst [vmem:[#allocation4 + $0x18] sm:$0xf] %v2301_v10  ;;  %1252 = vst [vmem:[#allocation4 + $0x38] sm:$0xf] %v2321_v11  ;;  %v1118_v3 = vpop.f32.mrb[15].mxu0  ;;  %v1236_v9 = vpop.f32.mrb[19].mxu1 }
 0x7bf   :  { %1131 = vst [vmem:[#allocation4 + $0x8] sm:$0xff] %v1118_v3  ;;  %1250 = vst [vmem:[#allocation4 + $0x28] sm:$0xff] %v1236_v9  ;;  %v1969_v9 = vld [vmem:[%s3127_s7 + $0x6] ss:$0 sm:$0xff] }
 0x7c5   :  { %v1383_v25 = vld [vmem:[#allocation4 + $0x16] sm:$0xf] }
 0x7c6   :  { %v1382_v30 = vld [vmem:[#allocation4 + $0xe] sm:$0xff]  ;;  %v1385_v32 = vld [vmem:[#allocation4 + $0x37] sm:$0xf]  ;;  %v1373_v33 = vld [vmem:[#allocation4 + $0x8] sm:$0xf] }
 0x7c7   :  { %v1384_v31 = vld [vmem:[#allocation4 + $0x2f] sm:$0xff]  ;;  %v1374_v6 = vld [vmem:[#allocation4 + $0x21] sm:$0xff]  ;;  %v1375_v34 = vld [vmem:[#allocation4 + $0x29] sm:$0xf]  ;;  %v1387_v35 = vadd.f32 %v1385_v32, %v1383_v25 }
 0x7c8   :  { %v1386_v26 = vadd.f32 %v1384_v31, %v1382_v30  ;;  %v1376_v36 = vadd.f32 %v1374_v6, %v1115_v7  ;;  %v1377_v37 = vadd.f32 %v1375_v34, %v1373_v33 }
 0x7db   :  { %v2340_v54 = vpop.f32.mrb[16].mxu0 }
 0x7dc   :  { %v1352_v12 = vpop.f32.mrb[17].mxu0  ;;  %v1390_v27 = vadd.f32 %v2340_v54, %v1386_v26 }
 0x7dd   :  { %1368 = vst [vmem:[#allocation4 + $0x40] sm:$0xff] %v1352_v12  ;;  %v2341_v28 = vpop.f32.mrb[18].mxu0 }
 0x7de   :  { %1371 = vst [vmem:[#allocation4 + $0x58] sm:$0xf] %v2341_v28  ;;  %v1355_v29 = vpop.f32.mrb[19].mxu0  ;;  %v1394_v44 = vrot.slane %v1390_v27, 4 }
 0x7df   :  { %1369 = vst [vmem:[#allocation4 + $0x48] sm:$0xff] %v1355_v29  ;;  %v1970_v29 = vld [vmem:[%s3127_s7 + $0x7] ss:$0 sm:$0xff] }
 0x7e5   :  { %v1389_v38 = vld [vmem:[#allocation4 + $0x58] sm:$0xf] }
 0x7e6   :  { %v1378_v39 = vld [vmem:[#allocation4 + $0x42] sm:$0xff]  ;;  %v1379_v40 = vld [vmem:[#allocation4 + $0x4a] sm:$0xf]  ;;  %v1391_v41 = vadd.f32 %v1389_v38, %v1387_v35 }
 0x7e7   :  { %v1380_v42 = vadd.f32 %v1378_v39, %v1376_v36  ;;  %v1381_v43 = vadd.f32 %v1379_v40, %v1377_v37 }
 0x7e8   :  { %v1395_v45 = vrot.slane %v1391_v41, 4 }
 0x7e9   :  { %v1399_v46 = vsel %vm69_vm1, %v1381_v43, %v1394_v44 }
 0x7ea   :  { %v1396_v47 = vsel %vm69_vm1, %v1394_v44, %v1395_v45  ;;  %v1416_v48 = vadd.f32 %v1399_v46, %v1380_v42 }
 0x7ec   :  { %v1417_v49 = vadd.f32 %v1416_v48, %v1396_v47 }
 0x7ee   :  { %v1418_v50 = vrot.slane %v1417_v49, 4 }
 0x7f0   :  { %v1419_v14 = vadd.f32 %v1418_v50, %v1417_v49 }
 0x7f2   :  { %v1420_v15 = vrot.slane %v1419_v14, 2 }
 0x7f4   :  { %v1421_v17 = vadd.f32 %v1420_v15, %v1419_v14 }
 0x7f6   :  { %v1422_v18 = vrot.slane %v1421_v17, 1 }
 0x7f8   :  { %v1423_v19 = vadd.f32 %v1422_v18, %v1421_v17 }
 0x7fa   :  { %2375 = vmatmul.mubr.f32.vlgmr.msra.gmra.mrb[20].mxu1 %v1423_v19 }
 0x7fb   :  { %2378 = vmatpush3.msk.msra.mxu1 %vm69_vm1, %v2922_v13  ;;  %2379 = vmatprep.mubr.msk.f32.mxu1 %vm2628_vm0, %v2627_v0 }
 0x7fc   :  { %2417 = vmatprep.subr.mxu1 %v2627_v0 }
 0x8cd   :  { %v1554_v20 = vpop.f32.mrb[20].mxu1 }
 0x8ce   :  { %v1559_v21 = vmul.f32 0.0034722222, %v1554_v20  ;;  %v2376_v16 = vpop.f32.mrb[21].mxu1 }
 0x8d0   :  { %2380 = vmatmul.mubr.msk.f32.vlgmr.msra.gmra.mrb[22].mxu1 %vm707_vm8, %v1559_v21 }
 0x8d1   :  { %2418 = vmatpush3.msk.msra.mxu1 %vm69_vm1, %v2922_v13  ;;  %2419 = vmatprep.mubr.msk.f32.mxu1 %vm2628_vm0, %v2627_v0 }
 0x9a3   :  { %v1629_v22 = vpop.f32.mrb[22].mxu1 }
 0x9a4   :  { %v1636_v23 = vrot.slane %v1629_v22, %v2950_v60  ;;  %v2381_v53 = vpop.f32.mrb[23].mxu1 }
 0x9a6   :  { %v1637_v58 = vsub.f32 %v1380_v42, %v1636_v23  ;;  %v1638_v63 = vsub.f32 %v1399_v46, %v1636_v23  ;;  %v1639_v24 = vsub.f32 %v1396_v47, %v1636_v23 }
 0x9a8   :  { %v1640_v51 = vmul.f32 %v1637_v58, %v1637_v58  ;;  %v1641_v52 = vmul.f32 %v1638_v63, %v1638_v63  ;;  %v1642_v55 = vmul.f32 %v1639_v24, %v1639_v24 }
 0x9aa   :  { %v1643_v56 = vadd.f32 %v1641_v52, %v1640_v51 }
 0x9ac   :  { %v1644_v57 = vadd.f32 %v1643_v56, %v1642_v55 }
 0x9ae   :  { %v1645_v59 = vrot.slane %v1644_v57, 4 }
 0x9b0   :  { %v1646_v1 = vadd.f32 %v1645_v59, %v1644_v57 }
 0x9b2   :  { %v1647_v61 = vrot.slane %v1646_v1, 2 }
 0x9b4   :  { %v1648_v62 = vadd.f32 %v1647_v61, %v1646_v1 }
 0x9b6   :  { %v1649_v13 = vrot.slane %v1648_v62, 1 }
 0x9b8   :  { %v1650_v2 = vadd.f32 %v1649_v13, %v1648_v62 }
 0x9ba   :  { %2415 = vmatmul.mubr.f32.vlgmr.msra.gmra.mrb[20].mxu0 %v1650_v2 }
 0xa8d   :  { %v1717_v0 = vpop.f32.mrb[20].mxu0 }
 0xa8e   :  { %v1721_v4 = vmul.f32 0.0034722222, %v1717_v0  ;;  %v2416_v5 = vpop.f32.mrb[21].mxu0 }
 0xa90   :  { %2420 = vmatmul.mubr.msk.f32.vlgmr.msra.gmra.mrb[24].mxu1 %vm707_vm8, %v1721_v4 }
 0xb63   :  { %v1791_v7 = vpop.f32.mrb[24].mxu1 }
 0xb64   :  { %v1792_v8 = vadd.f32 1e-05, %v1791_v7  ;;  %v2421_v10 = vpop.f32.mrb[25].mxu1 }
 0xb66   :  { %2625 = vrsqrt.f32 %v1792_v8 }
 0xb70   :  { %v2626_v11 = vpop.eup %2625 }
 0xb71   :  { %v1799_v3 = vrot.slane %v2626_v11, %v2950_v60 }
 0xb73   :  { %v1800_v54 = vmul.f32 %v1799_v3, %v1637_v58  ;;  %v1801_v12 = vmul.f32 %v1799_v3, %v1638_v63  ;;  %v1802_v28 = vmul.f32 %v1799_v3, %v1639_v24 }
 0xb75   :  { %v1808_v30 = vmul.f32 %v1969_v9, %v1800_v54  ;;  %v1809_v31 = vmul.f32 %v1969_v9, %v1801_v12  ;;  %v1810_v25 = vmul.f32 %v1969_v9, %v1802_v28 }
 0xb77   :  { %v1816_v32 = vadd.f32 %v1970_v29, %v1808_v30  ;;  %v1817_v26 = vadd.f32 %v1970_v29, %v1809_v31  ;;  %v1818_v33 = vadd.f32 %v1970_v29, %v1810_v25 }
 0xb79   :  { %v1819_v6 = vmax.f32 %v1816_v32, 0.0  ;;  %v1820_v34 = vmax.f32 %v1817_v26, 0.0  ;;  %v1821_v60 = vmax.f32 %v1818_v33, 0.0 }
 0xb7b   :  { %1822 = vst [vmem:[%s3129_s8] sm:$0xff] %v1819_v6  ;;  %1823 = vst [vmem:[%s3129_s8 + $0x8] sm:$0xff] %v1820_v34 }
 0xb7c   :  { %1824 = vst [vmem:[%s3129_s8 + $0x10] sm:$0xff] %v1821_v60 }

</bundles_post_ra>
